<compile_context>
chip_gen: v7x
topology: tpu7x:2x2x1
jax: 0.10.0
libtpu: 0.0.40
codegen_flags: <defaults>
</compile_context>

<pallas_src>
import functools
import math

import jax
import jax.numpy as jnp
from jax.experimental import pallas as pl
from jax.experimental.pallas import tpu as pltpu

LANE = 128      # vreg lane width: feature dims are zero-padded to multiples of this
SUBLANE = 8     # vreg sublane count


def _round_up(n, m):
    return ((n + m - 1) // m) * m


def _fused_mlp_kernel(*refs, num_layers):
    """One grid step: run the WHOLE MLP on one [TILE_B, in_pad] activation tile.

    refs = (x_ref, w0, b0, w1, b1, ..., w_{L-1}, b_{L-1}, o_ref)
    x_ref and weights are bf16 (MXU-native), biases f32, accumulation f32.
    The layer loop is a static Python loop (num_layers is trace-time constant),
    so intermediate activations never leave VMEM/vregs.
    """
    x_ref = refs[0]
    o_ref = refs[-1]
    wb = refs[1:-1]

    h = x_ref[...]                                        # [TILE_B, d0_pad] bf16 (no cast)
    for i in range(num_layers):
        w = wb[2 * i][...]                                # [d_in_pad, d_out_pad] bf16
        b = wb[2 * i + 1][...]                            # [1, d_out_pad] f32
        y = jnp.dot(h, w, preferred_element_type=jnp.float32) + b   # f32 MXU acc + epilogue
        if i < num_layers - 1:
            # f32 ReLU (VPU; safe on v5e which lacks bf16 VPU), then bf16 for next MXU pass.
            h = jnp.maximum(y, 0.0).astype(jnp.bfloat16)
        else:
            h = y
    o_ref[...] = h.astype(o_ref.dtype)                    # lane-dense (>=128) unmasked store


@functools.partial(jax.jit, static_argnames=("in_pad", "out_size", "tile_b"))
def _fused_mlp_forward(h, flat_params, *, in_pad, out_size, tile_b):
    """h: [B, in_size] (unpadded). flat_params: (w0,b0,...) lane-padded.

    Casts the activation to bf16 once, pads only the (ragged) batch axis,
    runs the fused kernel over a batch-tiled grid, and slices the valid
    [B, out_size] block back out — all inside one jit.
    """
    B, in_size = h.shape
    B_pad = _round_up(max(B, 1), tile_b)
    out_pad = flat_params[-1].shape[-1]
    num_layers = len(flat_params) // 2

    # One bf16 cast of the whole activation (halves the per-tile HBM stream
    # into the kernel).  Feature dim is normally already lane-dense (no pad);
    # only pad the batch axis when it is ragged.  Padded rows/lanes are zero
    # and meet zero-padded weight rows, so they never contaminate real lanes.
    x = h.astype(jnp.bfloat16)
    pad_rows = B_pad - B
    pad_cols = in_pad - in_size
    if pad_rows or pad_cols:
        x = jnp.pad(x, ((0, pad_rows), (0, pad_cols)))

    kernel = functools.partial(_fused_mlp_kernel, num_layers=num_layers)

    # Activation tile marches down the batch; weights/biases use a constant
    # index_map (full-array block) so they are copied once and stay VMEM-resident.
    in_specs = [pl.BlockSpec((tile_b, in_pad), lambda i: (i, 0))]
    for p in flat_params:
        in_specs.append(pl.BlockSpec(p.shape, lambda i: (0, 0)))

    out_pad_arr = pl.pallas_call(
        kernel,
        out_shape=jax.ShapeDtypeStruct((B_pad, out_pad), jnp.float32),
        grid=(B_pad // tile_b,),
        in_specs=in_specs,
        out_specs=pl.BlockSpec((tile_b, out_pad), lambda i: (i, 0)),
        compiler_params=pltpu.CompilerParams(
            dimension_semantics=("parallel",)),
        # NOTE: total VMEM here is a few MB (bf16 weights ~360 KB + double-
        # buffered 512x1024 bf16 activation tile), well under the 32 MiB scoped
        # default on every generation (v7x physical VMEM is 64 MiB).  If tile_b
        # is ever raised past ~2048 rows, set vmem_limit_bytes explicitly.
    )(x, *flat_params)

    return out_pad_arr[:B, :out_size]


class MLPPallas:
    """Mirror of the PyTorch MLP module; forward runs in one fused Pallas kernel."""

    # TODO(synk): the torch module accepts an arbitrary activation class string and a
    # dropout arg (default 0.0); ReLU is hard-coded here and dropout=0.0 is a no-op.

    def __init__(self, input_shape, hidden_size, output_shape, num_layers=10,
                 key=jax.random.PRNGKey(0)):
        self.input_shape = input_shape
        self.output_shape = output_shape if isinstance(output_shape, tuple) else (output_shape,)
        self.hidden_size = hidden_size
        self.num_layers = num_layers
        self.input_size = (int(math.prod(input_shape))
                           if isinstance(input_shape, tuple) else int(input_shape))
        self.output_size = int(math.prod(self.output_shape))

        # Layer sizes: in -> hidden, (num_layers-1) x hidden -> hidden, hidden -> out
        dims = [self.input_size] + [self.hidden_size] * self.num_layers + [self.output_size]
        dims_pad = [_round_up(d, LANE) for d in dims]
        self.in_pad = dims_pad[0]

        self.params_f32 = []   # unpadded f32 (w, b) — reference / numerics check
        flat = []
        for i, (fan_in, fan_out) in enumerate(zip(dims[:-1], dims[1:])):
            key, kw, kb = jax.random.split(key, 3)
            bound = 1.0 / math.sqrt(fan_in)          # same init range as torch.nn.Linear
            w = jax.random.uniform(kw, (fan_in, fan_out), jnp.float32, -bound, bound)
            b = jax.random.uniform(kb, (fan_out,), jnp.float32, -bound, bound)
            self.params_f32.append((w, b))

            fi_p, fo_p = dims_pad[i], dims_pad[i + 1]
            # Zero-pad to lane-dense shapes; padded rows/cols/bias lanes are
            # exactly 0 so padding never contaminates real lanes (even through ReLU).
            w_pad = (jnp.zeros((fi_p, fo_p), jnp.float32)
                     .at[:fan_in, :fan_out].set(w)
                     .astype(jnp.bfloat16))                       # bf16 for the MXU
            b_pad = jnp.zeros((1, fo_p), jnp.float32).at[:, :fan_out].set(b)
            flat.extend([w_pad, b_pad])
        self.flat_params = tuple(flat)

    def _flatten(self, x):
        if x.ndim == 3:
            return x.reshape(-1, self.input_size)
        if x.ndim == 4:
            return x.reshape(x.shape[0], -1)         # NCHW -> [B, C*H*W]
        raise ValueError("MLP forward expects 3-D or 4-D input (as in the torch module)")

    def forward(self, x):
        h = self._flatten(x)
        B = h.shape[0]
        # MXU-aligned batch tile: 256 rows for small batches, 512 for large.
        # Both are multiples of 256 (v6e/v7x MXU M) and 128 (v5e MXU M), so no
        # partial systolic passes, and only two compile buckets for tile_b.
        # Larger batches give multiple "parallel" grid steps -> both v7x TCs busy.
        tile_b = 256 if B <= 256 else 512
        out = _fused_mlp_forward(h, self.flat_params,
                                 in_pad=self.in_pad,
                                 out_size=self.output_size,
                                 tile_b=tile_b)
        return out.reshape(B, *self.output_shape)

    __call__ = forward

    def reference_forward(self, x):
        """Pure-JAX f32 reference (unpadded weights) for validation."""
        h = self._flatten(x).astype(jnp.float32)
        n = len(self.params_f32)
        for i, (w, b) in enumerate(self.params_f32):
            h = h @ w + b
            if i < n - 1:
                h = jnp.maximum(h, 0.0)
        return h.reshape(h.shape[0], *self.output_shape)


if __name__ == "__main__":
    key = jax.random.PRNGKey(0)
    # input_shape matches NCHW input (2, 4, 16, 16) -> input_size = 4*16*16 = 1024
    input_shape = (4, 16, 16)
    hidden_size = 32
    output_shape = (8,)
    num_layers = 3

    k_x, k_p = jax.random.split(key)
    x = jax.random.normal(k_x, (2, 4, 16, 16), dtype=jnp.float32)

    model = MLPPallas(input_shape, hidden_size, output_shape,
                      num_layers=num_layers, key=k_p)
    out = jax.block_until_ready(model(x))

    # sanity: shape + numerics vs. pure-JAX f32 reference (bf16 MXU tolerance)
    assert out.shape == (2, 8), out.shape
    assert bool(jnp.all(jnp.isfinite(out)))
    ref = model.reference_forward(x)
    assert bool(jnp.allclose(out, ref, rtol=5e-2, atol=5e-2)), (
        float(jnp.max(jnp.abs(out - ref))))
    print("KERNEL_OK")
</pallas_src>

<mosaic_0001>
module attributes {stable_mosaic.version = 11 : i64} {
  func.func @_fused_mlp_kernel(%arg0: i32, %arg1: memref<256x1024xbf16, #tpu.memory_space<vmem>>, %arg2: memref<1024x128xbf16, #tpu.memory_space<vmem>>, %arg3: memref<1x128xf32, #tpu.memory_space<vmem>>, %arg4: memref<128x128xbf16, #tpu.memory_space<vmem>>, %arg5: memref<1x128xf32, #tpu.memory_space<vmem>>, %arg6: memref<128x128xbf16, #tpu.memory_space<vmem>>, %arg7: memref<1x128xf32, #tpu.memory_space<vmem>>, %arg8: memref<128x128xbf16, #tpu.memory_space<vmem>>, %arg9: memref<1x128xf32, #tpu.memory_space<vmem>>, %arg10: memref<256x128xf32, #tpu.memory_space<vmem>>) attributes {dimension_semantics = [#tpu.dimension_semantics<parallel>], iteration_bounds = array<i64: 1>, scalar_prefetch = 0 : i64, scratch_operands = 0 : i64, tpu.core_type = #tpu.core_type<tc>, window_params = [{transform_indices = @transform_0, window_bounds = array<i64: 256, 1024>}, {pipeline_mode = #tpu.pipeline_mode<synchronous>, transform_indices = @transform_1, window_bounds = array<i64: 1024, 128>}, {pipeline_mode = #tpu.pipeline_mode<synchronous>, transform_indices = @transform_2, window_bounds = array<i64: 1, 128>}, {pipeline_mode = #tpu.pipeline_mode<synchronous>, transform_indices = @transform_3, window_bounds = array<i64: 128, 128>}, {pipeline_mode = #tpu.pipeline_mode<synchronous>, transform_indices = @transform_4, window_bounds = array<i64: 1, 128>}, {pipeline_mode = #tpu.pipeline_mode<synchronous>, transform_indices = @transform_5, window_bounds = array<i64: 128, 128>}, {pipeline_mode = #tpu.pipeline_mode<synchronous>, transform_indices = @transform_6, window_bounds = array<i64: 1, 128>}, {pipeline_mode = #tpu.pipeline_mode<synchronous>, transform_indices = @transform_7, window_bounds = array<i64: 128, 128>}, {pipeline_mode = #tpu.pipeline_mode<synchronous>, transform_indices = @transform_8, window_bounds = array<i64: 1, 128>}, {transform_indices = @transform_9, window_bounds = array<i64: 256, 128>}]} {
    %c0 = arith.constant 0 : index
    %c0_0 = arith.constant 0 : index
    %0 = vector.load %arg1[%c0, %c0_0] : memref<256x1024xbf16, #tpu.memory_space<vmem>>, vector<256x1024xbf16>
    %c0_1 = arith.constant 0 : index
    %c0_2 = arith.constant 0 : index
    %1 = vector.load %arg2[%c0_1, %c0_2] : memref<1024x128xbf16, #tpu.memory_space<vmem>>, vector<1024x128xbf16>
    %c0_3 = arith.constant 0 : index
    %c0_4 = arith.constant 0 : index
    %2 = vector.load %arg3[%c0_3, %c0_4] : memref<1x128xf32, #tpu.memory_space<vmem>>, vector<1x128xf32>
    %cst = arith.constant dense<0.000000e+00> : vector<256x128xf32>
    %3 = tpu.matmul %0, %1, %cst {dimension_numbers = #tpu.dot_dimension_numbers<[1], [0], [0], [1], [0, 0, 1, 1], [], []>} : vector<256x1024xbf16>, vector<1024x128xbf16>, vector<256x128xf32> -> vector<256x128xf32>
    %4 = vector.broadcast %2 : vector<1x128xf32> to vector<256x128xf32>
    %5 = arith.addf %3, %4 : vector<256x128xf32>
    %cst_5 = arith.constant 0.000000e+00 : f32
    %6 = vector.broadcast %cst_5 : f32 to vector<256x128xf32>
    %7 = arith.maximumf %5, %6 : vector<256x128xf32>
    %8 = arith.truncf %7 : vector<256x128xf32> to vector<256x128xbf16>
    %c0_6 = arith.constant 0 : index
    %c0_7 = arith.constant 0 : index
    %9 = vector.load %arg4[%c0_6, %c0_7] : memref<128x128xbf16, #tpu.memory_space<vmem>>, vector<128x128xbf16>
    %c0_8 = arith.constant 0 : index
    %c0_9 = arith.constant 0 : index
    %10 = vector.load %arg5[%c0_8, %c0_9] : memref<1x128xf32, #tpu.memory_space<vmem>>, vector<1x128xf32>
    %cst_10 = arith.constant dense<0.000000e+00> : vector<256x128xf32>
    %11 = tpu.matmul %8, %9, %cst_10 {dimension_numbers = #tpu.dot_dimension_numbers<[1], [0], [0], [1], [0, 0, 1, 1], [], []>} : vector<256x128xbf16>, vector<128x128xbf16>, vector<256x128xf32> -> vector<256x128xf32>
    %12 = vector.broadcast %10 : vector<1x128xf32> to vector<256x128xf32>
    %13 = arith.addf %11, %12 : vector<256x128xf32>
    %cst_11 = arith.constant 0.000000e+00 : f32
    %14 = vector.broadcast %cst_11 : f32 to vector<256x128xf32>
    %15 = arith.maximumf %13, %14 : vector<256x128xf32>
    %16 = arith.truncf %15 : vector<256x128xf32> to vector<256x128xbf16>
    %c0_12 = arith.constant 0 : index
    %c0_13 = arith.constant 0 : index
    %17 = vector.load %arg6[%c0_12, %c0_13] : memref<128x128xbf16, #tpu.memory_space<vmem>>, vector<128x128xbf16>
    %c0_14 = arith.constant 0 : index
    %c0_15 = arith.constant 0 : index
    %18 = vector.load %arg7[%c0_14, %c0_15] : memref<1x128xf32, #tpu.memory_space<vmem>>, vector<1x128xf32>
    %cst_16 = arith.constant dense<0.000000e+00> : vector<256x128xf32>
    %19 = tpu.matmul %16, %17, %cst_16 {dimension_numbers = #tpu.dot_dimension_numbers<[1], [0], [0], [1], [0, 0, 1, 1], [], []>} : vector<256x128xbf16>, vector<128x128xbf16>, vector<256x128xf32> -> vector<256x128xf32>
    %20 = vector.broadcast %18 : vector<1x128xf32> to vector<256x128xf32>
    %21 = arith.addf %19, %20 : vector<256x128xf32>
    %cst_17 = arith.constant 0.000000e+00 : f32
    %22 = vector.broadcast %cst_17 : f32 to vector<256x128xf32>
    %23 = arith.maximumf %21, %22 : vector<256x128xf32>
    %24 = arith.truncf %23 : vector<256x128xf32> to vector<256x128xbf16>
    %c0_18 = arith.constant 0 : index
    %c0_19 = arith.constant 0 : index
    %25 = vector.load %arg8[%c0_18, %c0_19] : memref<128x128xbf16, #tpu.memory_space<vmem>>, vector<128x128xbf16>
    %c0_20 = arith.constant 0 : index
    %c0_21 = arith.constant 0 : index
    %26 = vector.load %arg9[%c0_20, %c0_21] : memref<1x128xf32, #tpu.memory_space<vmem>>, vector<1x128xf32>
    %cst_22 = arith.constant dense<0.000000e+00> : vector<256x128xf32>
    %27 = tpu.matmul %24, %25, %cst_22 {dimension_numbers = #tpu.dot_dimension_numbers<[1], [0], [0], [1], [0, 0, 1, 1], [], []>} : vector<256x128xbf16>, vector<128x128xbf16>, vector<256x128xf32> -> vector<256x128xf32>
    %28 = vector.broadcast %26 : vector<1x128xf32> to vector<256x128xf32>
    %29 = arith.addf %27, %28 : vector<256x128xf32>
    %c0_23 = arith.constant 0 : index
    %c0_24 = arith.constant 0 : index
    %30 = vector.load %arg10[%c0_23, %c0_24] : memref<256x128xf32, #tpu.memory_space<vmem>>, vector<256x128xf32>
    tpu.vector_store %arg10[%c0_23, %c0_24], %29 {strides = array<i32>} : memref<256x128xf32, #tpu.memory_space<vmem>>, vector<256x128xf32>,
    return
  }
  func.func @transform_0(%arg0: i32) -> (i32, i32) {
    %c0_i32 = arith.constant 0 : i32
    %c0_i32_0 = arith.constant 0 : i32
    return %arg0, %c0_i32 : i32, i32
  }
  func.func @transform_1(%arg0: i32) -> (i32, i32) {
    %c0_i32 = arith.constant 0 : i32
    %c0_i32_0 = arith.constant 0 : i32
    %c0_i32_1 = arith.constant 0 : i32
    return %c0_i32, %c0_i32_0 : i32, i32
  }
  func.func @transform_2(%arg0: i32) -> (i32, i32) {
    %c0_i32 = arith.constant 0 : i32
    %c0_i32_0 = arith.constant 0 : i32
    %c0_i32_1 = arith.constant 0 : i32
    return %c0_i32, %c0_i32_0 : i32, i32
  }
  func.func @transform_3(%arg0: i32) -> (i32, i32) {
    %c0_i32 = arith.constant 0 : i32
    %c0_i32_0 = arith.constant 0 : i32
    %c0_i32_1 = arith.constant 0 : i32
    return %c0_i32, %c0_i32_0 : i32, i32
  }
  func.func @transform_4(%arg0: i32) -> (i32, i32) {
    %c0_i32 = arith.constant 0 : i32
    %c0_i32_0 = arith.constant 0 : i32
    %c0_i32_1 = arith.constant 0 : i32
    return %c0_i32, %c0_i32_0 : i32, i32
  }
  func.func @transform_5(%arg0: i32) -> (i32, i32) {
    %c0_i32 = arith.constant 0 : i32
    %c0_i32_0 = arith.constant 0 : i32
    %c0_i32_1 = arith.constant 0 : i32
    return %c0_i32, %c0_i32_0 : i32, i32
  }
  func.func @transform_6(%arg0: i32) -> (i32, i32) {
    %c0_i32 = arith.constant 0 : i32
    %c0_i32_0 = arith.constant 0 : i32
    %c0_i32_1 = arith.constant 0 : i32
    return %c0_i32, %c0_i32_0 : i32, i32
  }
  func.func @transform_7(%arg0: i32) -> (i32, i32) {
    %c0_i32 = arith.constant 0 : i32
    %c0_i32_0 = arith.constant 0 : i32
    %c0_i32_1 = arith.constant 0 : i32
    return %c0_i32, %c0_i32_0 : i32, i32
  }
  func.func @transform_8(%arg0: i32) -> (i32, i32) {
    %c0_i32 = arith.constant 0 : i32
    %c0_i32_0 = arith.constant 0 : i32
    %c0_i32_1 = arith.constant 0 : i32
    return %c0_i32, %c0_i32_0 : i32, i32
  }
  func.func @transform_9(%arg0: i32) -> (i32, i32) {
    %c0_i32 = arith.constant 0 : i32
    %c0_i32_0 = arith.constant 0 : i32
    return %arg0, %c0_i32 : i32, i32
  }
}

</mosaic_0001>

<bundles_post_ra>
// kernel: _fused_mlp_forward.1
= control target key start
LH: loop header
LB: loop body
LE: loop exit
PB: predicated region body
PF: predicated region fallthrough
CT: control target
= control target key end

     0   :  { %s5028_s1 = inlined_call_operand.vmem [shape: bf16[1024,128], index: 1, kind: input, shape index: {}]   ;;  %s5029_s0 = inlined_call_operand.vmem [shape: bf16[256,1024], index: 0, kind: input, shape index: {}]   ;;  %s5030_s3 = inlined_call_operand.vmem [shape: bf16[128,128], index: 3, kind: input, shape index: {}]   ;;  %s5031_s2 = inlined_call_operand.vmem [shape: f32[1,128], index: 2, kind: input, shape index: {}]   ;;  %s5032_s5 = inlined_call_operand.vmem [shape: bf16[128,128], index: 5, kind: input, shape index: {}]   ;;  %s5033_s4 = inlined_call_operand.vmem [shape: f32[1,128], index: 4, kind: input, shape index: {}]   ;;  %s5034_s7 = inlined_call_operand.vmem [shape: bf16[128,128], index: 7, kind: input, shape index: {}]   ;;  %s5035_s6 = inlined_call_operand.vmem [shape: f32[1,128], index: 6, kind: input, shape index: {}]   ;;  %s5036_s8 = inlined_call_operand.vmem [shape: f32[1,128], index: 8, kind: input, shape index: {}]   ;;  %s5037_s9 = inlined_call_operand.vmem [shape: f32[256,128], index: 9, kind: output, shape index: {}]  }
   0x1   :  { %v3740_v0 = vld [vmem:[%s5028_s1 + $0x40] sm:$0xff]   ;;  %v3742_v2 = vld [vmem:[%s5028_s1 + $0x48] sm:$0xff]   ;;  %v3744_v4 = vld [vmem:[%s5028_s1 + $0x50] sm:$0xff]  }
   0x2   :  { %v3741_v1 = vld [vmem:[%s5028_s1] sm:$0xff]   ;;  %3060 = vmatprep.subr.bf16.mxu0 %v3740_v0  ;;  %3724 = vmatprep.subr.bf16.mxu1 %v3740_v0  ;;  %v3743_v3 = vld [vmem:[%s5028_s1 + $0x8] sm:$0xff]   ;;  %v3745_v5 = vld [vmem:[%s5028_s1 + $0x10] sm:$0xff]  }
   0x3   :  { %3061 = vmatpush3.bf16.msra.mxu0 %v3741_v1  ;;  %3732 = vmatpush3.bf16.msra.mxu1 %v3741_v1  ;;  %v3746_v6 = vld [vmem:[%s5028_s1 + $0x58] sm:$0xff]   ;;  %v3748_v8 = vld [vmem:[%s5028_s1 + $0x60] sm:$0xff]   ;;  %v3750_v10 = vld [vmem:[%s5028_s1 + $0x68] sm:$0xff]  }
   0x4   :  { %3062 = vmatprep.subr.bf16.mxu0 %v3742_v2  ;;  %3725 = vmatprep.subr.bf16.mxu1 %v3742_v2  ;;  %v3747_v7 = vld [vmem:[%s5028_s1 + $0x18] sm:$0xff]   ;;  %v3749_v9 = vld [vmem:[%s5028_s1 + $0x20] sm:$0xff]   ;;  %v3751_v17 = vld [vmem:[%s5028_s1 + $0x28] sm:$0xff]  }
   0x5   :  { %v33_v11 = vld [vmem:[%s5029_s0] sm:$0xff]  ;;  %v3752_v18 = vld [vmem:[%s5028_s1 + $0x70] sm:$0xff]   ;;  %v3754_v20 = vld [vmem:[%s5028_s1 + $0x78] sm:$0xff]  }
   0x6   :  { %v37_v12 = vld [vmem:[%s5029_s0 + $0x20] sm:$0xff]  ;;  %v3753_v19 = vld [vmem:[%s5028_s1 + $0x30] sm:$0xff]   ;;  %v3755_v21 = vld [vmem:[%s5028_s1 + $0x38] sm:$0xff]  }
   0x7   :  { %3063 = vmatpush3.bf16.msra.mxu0 %v3743_v3  ;;  %3733 = vmatpush3.bf16.msra.mxu1 %v3743_v3  ;;  %v129_v13 = vld [vmem:[%s5029_s0 + $0x300] sm:$0xff]  ;;  %v2842_v14 = vcombine.high %v33_v11, %v37_v12  ;;  %v2841_v27 = vcombine.low %v33_v11, %v37_v12  ;;  %v3758_v31 = vld [vmem:[%s5028_s1 + $0xc8] sm:$0xff]   ;;  %v3760_v34 = vld [vmem:[%s5028_s1 + $0xd0] sm:$0xff]  }
   0x8   :  { %3064 = vmatprep.subr.bf16.mxu0 %v3744_v4  ;;  %3726 = vmatprep.subr.bf16.mxu1 %v3744_v4  ;;  %v133_v15 = vld [vmem:[%s5029_s0 + $0x320] sm:$0xff]  ;;  %v3759_v33 = vld [vmem:[%s5028_s1 + $0x88] sm:$0xff]   ;;  %v3761_v41 = vld [vmem:[%s5028_s1 + $0x90] sm:$0xff]  }
   0x9   :  { %v2938_v16 = vcombine.high %v129_v13, %v133_v15  ;;  %1352 = vmatprep.mubr.bf16.mxu0 %v2842_v14  ;;  %v3756_v22 = vld [vmem:[%s5028_s1 + $0xc0] sm:$0xff]   ;;  %v2937_v28 = vcombine.low %v129_v13, %v133_v15  ;;  %v3762_v43 = vld [vmem:[%s5028_s1 + $0xd8] sm:$0xff]   ;;  %v3766_v56 = vld [vmem:[%s5028_s1 + $0xe8] sm:$0xff]  }
   0xa   :  { %v41_v23 = vld [vmem:[%s5029_s0 + $0x40] sm:$0xff]  ;;  %v3763_v45 = vld [vmem:[%s5028_s1 + $0x98] sm:$0xff]   ;;  %v3767_v58 = vld [vmem:[%s5028_s1 + $0xa8] sm:$0xff]  }
   0xb   :  { %3065 = vmatpush3.bf16.msra.mxu0 %v3745_v5  ;;  %3734 = vmatpush3.bf16.msra.mxu1 %v3745_v5  ;;  %v45_v24 = vld [vmem:[%s5029_s0 + $0x60] sm:$0xff]  ;;  %v3768_v60 = vld [vmem:[%s5028_s1 + $0xf0] sm:$0xff]   ;;  %v34_v63 = vld [vmem:[%s5029_s0 + $0x8] sm:$0xff] }
   0xc   :  { %3066 = vmatprep.subr.bf16.mxu0 %v3746_v6  ;;  %3727 = vmatprep.subr.bf16.mxu1 %v3746_v6  ;;  %v137_v25 = vld [vmem:[%s5029_s0 + $0x340] sm:$0xff]  ;;  %v2850_v30 = vcombine.high %v41_v23, %v45_v24  ;;  %v2849_v39 = vcombine.low %v41_v23, %v45_v24  ;;  %v38_v0 = vld [vmem:[%s5029_s0 + $0x28] sm:$0xff]  ;;  %v3769_v5 = vld [vmem:[%s5028_s1 + $0xb0] sm:$0xff]  }
   0xd   :  { %1448 = vmatprep.mubr.bf16.mxu1 %v2938_v16  ;;  %v141_v26 = vld [vmem:[%s5029_s0 + $0x360] sm:$0xff]  ;;  %v3780_v1 = vld [vmem:[%s5028_s1 + $0x148] sm:$0xff]   ;;  %v3783_v11 = vld [vmem:[%s5028_s1 + $0x110] sm:$0xff]  }
   0xe   :  { %v3757_v29 = vld [vmem:[%s5028_s1 + $0x80] sm:$0xff]   ;;  %v2946_v32 = vcombine.high %v137_v25, %v141_v26  ;;  %v2945_v40 = vcombine.low %v137_v25, %v141_v26  ;;  %v3781_v2 = vld [vmem:[%s5028_s1 + $0x108] sm:$0xff]   ;;  %v3784_v14 = vld [vmem:[%s5028_s1 + $0x158] sm:$0xff]  }
   0xf   :  { %3067 = vmatpush3.bf16.msra.mxu0 %v3747_v7  ;;  %3735 = vmatpush3.bf16.msra.mxu1 %v3747_v7  ;;  %v49_v35 = vld [vmem:[%s5029_s0 + $0x80] sm:$0xff]  ;;  %v3770_v7 = vld [vmem:[%s5028_s1 + $0xf8] sm:$0xff]   ;;  %v42_v16 = vld [vmem:[%s5029_s0 + $0x48] sm:$0xff] }
  0x10   :  { %3068 = vmatprep.subr.bf16.mxu0 %v3748_v8  ;;  %3728 = vmatprep.subr.bf16.mxu1 %v3748_v8  ;;  %v53_v36 = vld [vmem:[%s5029_s0 + $0xa0] sm:$0xff]  ;;  %v2844_v8 = vcombine.high %v34_v63, %v38_v0  ;;  %v3774_v23 = vld [vmem:[%s5028_s1 + $0x1c8] sm:$0xff]   ;;  %v3785_v24 = vld [vmem:[%s5028_s1 + $0x118] sm:$0xff]  }
  0x11   :  { %v145_v37 = vld [vmem:[%s5029_s0 + $0x380] sm:$0xff]  ;;  %v2858_v42 = vcombine.high %v49_v35, %v53_v36  ;;  %v2857_v51 = vcombine.low %v49_v35, %v53_v36 }
  0x12   :  { %v149_v38 = vld [vmem:[%s5029_s0 + $0x3a0] sm:$0xff] }
  0x13   :  { %3069 = vmatpush3.bf16.msra.mxu0 %v3749_v9  ;;  %3736 = vmatpush3.bf16.msra.mxu1 %v3749_v9  ;;  %v2954_v44 = vcombine.high %v145_v37, %v149_v38  ;;  %v3764_v46 = vld [vmem:[%s5028_s1 + $0xe0] sm:$0xff]   ;;  %v2953_v52 = vcombine.low %v145_v37, %v149_v38  ;;  %v3771_v9 = vld [vmem:[%s5028_s1 + $0xb8] sm:$0xff]   ;;  %v3779_v37 = vld [vmem:[%s5028_s1 + $0x190] sm:$0xff]  }
  0x14   :  { %3070 = vmatprep.subr.bf16.mxu0 %v3750_v10  ;;  %3729 = vmatprep.subr.bf16.mxu1 %v3750_v10  ;;  %v57_v47 = vld [vmem:[%s5029_s0 + $0xc0] sm:$0xff]  ;;  %v3782_v10 = vld [vmem:[%s5028_s1 + $0x150] sm:$0xff]   ;;  %v3787_v38 = vld [vmem:[%s5028_s1 + $0x1d8] sm:$0xff]  }
  0x15   :  { %v61_v48 = vld [vmem:[%s5029_s0 + $0xe0] sm:$0xff] }
  0x16   :  { %v153_v49 = vld [vmem:[%s5029_s0 + $0x3c0] sm:$0xff]  ;;  %v2866_v54 = vcombine.high %v57_v47, %v61_v48  ;;  %v2865_v3 = vcombine.low %v57_v47, %v61_v48  ;;  %v3793_v47 = vld [vmem:[%s5028_s1 + $0x130] sm:$0xff]  }
  0x17   :  { %3071 = vmatpush3.bf16.msra.mxu0 %v3751_v17  ;;  %3737 = vmatpush3.bf16.msra.mxu1 %v3751_v17  ;;  %v157_v50 = vld [vmem:[%s5029_s0 + $0x3e0] sm:$0xff]  ;;  %v46_v17 = vld [vmem:[%s5029_s0 + $0x68] sm:$0xff] }
  0x18   :  { %3072 = vmatprep.subr.bf16.mxu0 %v3752_v18  ;;  %3730 = vmatprep.subr.bf16.mxu1 %v3752_v18  ;;  %v3765_v53 = vld [vmem:[%s5028_s1 + $0xa0] sm:$0xff]   ;;  %v2962_v57 = vcombine.high %v153_v49, %v157_v50  ;;  %v2961_v4 = vcombine.low %v153_v49, %v157_v50  ;;  %v2843_v18 = vcombine.low %v34_v63, %v38_v0 }
  0x19   :  { %v3776_v55 = vld [vmem:[%s5028_s1 + $0x140] sm:$0xff]  }
  0x1a   :  { %v3777_v59 = vld [vmem:[%s5028_s1 + $0x100] sm:$0xff]  }
  0x1b   :  { %3073 = vmatpush3.bf16.msra.mxu0 %v3753_v19  ;;  %3738 = vmatpush3.bf16.msra.mxu1 %v3753_v19  ;;  %v65_v61 = vld [vmem:[%s5029_s0 + $0x100] sm:$0xff] }
  0x1c   :  { %3074 = vmatprep.subr.bf16.mxu0 %v3754_v20  ;;  %3731 = vmatprep.subr.bf16.mxu1 %v3754_v20  ;;  %v69_v62 = vld [vmem:[%s5029_s0 + $0x120] sm:$0xff] }
  0x1d   :  { %v2874_v6 = vcombine.high %v65_v61, %v69_v62  ;;  %v3772_v12 = vld [vmem:[%s5028_s1 + $0x1c0] sm:$0xff]   ;;  %v2873_v19 = vcombine.low %v65_v61, %v69_v62  ;;  %v3799_v61 = vld [vmem:[%s5028_s1 + $0x1a8] sm:$0xff]   ;;  %v3800_v62 = vld [vmem:[%s5028_s1 + $0x1f0] sm:$0xff]  }
  0x1e   :  { %v73_v13 = vld [vmem:[%s5029_s0 + $0x140] sm:$0xff] }
  0x1f   :  { %3075 = vmatpush3.bf16.msra.mxu0 %v3755_v21  ;;  %3739 = vmatpush3.bf16.msra.mxu1 %v3755_v21  ;;  %v77_v15 = vld [vmem:[%s5029_s0 + $0x160] sm:$0xff] }
  0x20   :  { %3172 = vmatprep.subr.bf16.mxu1 %v3756_v22  ;;  %3284 = vmatprep.subr.bf16.mxu0 %v3776_v55  ;;  %v3773_v20 = vld [vmem:[%s5028_s1 + $0x180] sm:$0xff]   ;;  %v2882_v21 = vcombine.high %v73_v13, %v77_v15  ;;  %v2852_v22 = vcombine.high %v42_v16, %v46_v17  ;;  %v3795_v55 = vld [vmem:[%s5028_s1 + $0x138] sm:$0xff]  }
  0x21   :  { %v81_v25 = vld [vmem:[%s5029_s0 + $0x180] sm:$0xff] }
  0x22   :  { %1353 = vmatmul.mubr.bf16.vlgmr.msra.gmra.mrb[0].mxu0 %v2841_v27  ;;  %1449 = vmatmul.mubr.bf16.vlgmr.msra.gmra.mrb[0].mxu1 %v2937_v28  ;;  %v85_v26 = vld [vmem:[%s5029_s0 + $0x1a0] sm:$0xff]  ;;  %v50_v28 = vld [vmem:[%s5029_s0 + $0x88] sm:$0xff] }
  0x23   :  { %3173 = vmatpush3.bf16.msra.mxu1 %v3757_v29  ;;  %1360 = vmatprep.mubr.bf16.mxu0 %v2850_v30  ;;  %v3786_v27 = vld [vmem:[%s5028_s1 + $0x160] sm:$0xff]   ;;  %v54_v29 = vld [vmem:[%s5029_s0 + $0xa8] sm:$0xff]  ;;  %v2890_v35 = vcombine.high %v81_v25, %v85_v26  ;;  %v2889_v49 = vcombine.low %v81_v25, %v85_v26 }
  0x24   :  { %3174 = vmatprep.subr.bf16.mxu1 %v3758_v31  ;;  %1456 = vmatprep.mubr.bf16.mxu1 %v2946_v32  ;;  %v3775_v30 = vld [vmem:[%s5028_s1 + $0x188] sm:$0xff]   ;;  %v3778_v31 = vld [vmem:[%s5028_s1 + $0x1d0] sm:$0xff]   ;;  %v3788_v32 = vld [vmem:[%s5028_s1 + $0x120] sm:$0xff]   ;;  %v2860_v36 = vcombine.high %v50_v28, %v54_v29  ;;  %v2859_v50 = vcombine.low %v50_v28, %v54_v29 }
  0x25   :  { %3285 = vmatpush3.bf16.msra.mxu0 %v3777_v59  ;;  %v3796_v48 = vld [vmem:[%s5028_s1 + $0x1e0] sm:$0xff]   ;;  %v66_v59 = vld [vmem:[%s5029_s0 + $0x108] sm:$0xff] }
  0x26   :  { %3286 = vmatprep.subr.bf16.mxu0 %v3780_v1  ;;  %v94_v25 = vld [vmem:[%s5029_s0 + $0x1e8] sm:$0xff] }
  0x27   :  { %3175 = vmatpush3.bf16.msra.mxu1 %v3759_v33  ;;  %v2881_v33 = vcombine.low %v73_v13, %v77_v15  ;;  %v117_v15 = vld [vmem:[%s5029_s0 + $0x2a0] sm:$0xff] }
  0x28   :  { %3176 = vmatprep.subr.bf16.mxu1 %v3760_v34  ;;  %v2851_v34 = vcombine.low %v42_v16, %v46_v17  ;;  %v82_v16 = vld [vmem:[%s5029_s0 + $0x188] sm:$0xff] }
  0x29   :  { %3287 = vmatpush3.bf16.msra.mxu0 %v3781_v2  ;;  %v86_v17 = vld [vmem:[%s5029_s0 + $0x1a8] sm:$0xff] }
  0x2a   :  { %1361 = vmatmul.mubr.bf16.gmra.mrb[4].mxu0 %v2849_v39  ;;  %1457 = vmatmul.mubr.bf16.gmra.mrb[4].mxu1 %v2945_v40  ;;  %v3790_v39 = vld [vmem:[%s5028_s1 + $0x168] sm:$0xff]  }
  0x2b   :  { %3177 = vmatpush3.bf16.msra.mxu1 %v3761_v41  ;;  %1368 = vmatprep.mubr.bf16.mxu0 %v2858_v42  ;;  %v3791_v40 = vld [vmem:[%s5028_s1 + $0x128] sm:$0xff]   ;;  %v3792_v41 = vld [vmem:[%s5028_s1 + $0x170] sm:$0xff]   ;;  %v89_v42 = vld [vmem:[%s5029_s0 + $0x1c0] sm:$0xff] }
  0x2c   :  { %3178 = vmatprep.subr.bf16.mxu1 %v3762_v43  ;;  %1464 = vmatprep.mubr.bf16.mxu1 %v2954_v44  ;;  %v93_v43 = vld [vmem:[%s5029_s0 + $0x1e0] sm:$0xff]  ;;  %v58_v44 = vld [vmem:[%s5029_s0 + $0xc8] sm:$0xff] }
  0x2d   :  { %3288 = vmatprep.subr.bf16.mxu0 %v3782_v10  ;;  %v2897_v63 = vcombine.low %v89_v42, %v93_v43 }
  0x2e   :  { %3289 = vmatpush3.bf16.msra.mxu0 %v3783_v11 }
  0x2f   :  { %3179 = vmatpush3.bf16.msra.mxu1 %v3763_v45  ;;  %3290 = vmatprep.subr.bf16.mxu0 %v3784_v14  ;;  %v62_v45 = vld [vmem:[%s5029_s0 + $0xe8] sm:$0xff]  ;;  %v113_v14 = vld [vmem:[%s5029_s0 + $0x280] sm:$0xff] }
  0x30   :  { %3180 = vmatprep.subr.bf16.mxu1 %v3764_v46  ;;  %v3789_v46 = vld [vmem:[%s5028_s1 + $0x198] sm:$0xff]   ;;  %v2867_v0 = vcombine.low %v58_v44, %v62_v45  ;;  %v2921_v26 = vcombine.low %v113_v14, %v117_v15 }
  0x32   :  { %1369 = vmatmul.mubr.bf16.gmra.mrb[8].mxu0 %v2857_v51  ;;  %1465 = vmatmul.mubr.bf16.gmra.mrb[8].mxu1 %v2953_v52  ;;  %v2898_v51 = vcombine.high %v89_v42, %v93_v43  ;;  %v2868_v52 = vcombine.high %v58_v44, %v62_v45 }
  0x33   :  { %3181 = vmatpush3.bf16.msra.mxu1 %v3765_v53  ;;  %1376 = vmatprep.mubr.bf16.mxu0 %v2866_v54  ;;  %v3794_v53 = vld [vmem:[%s5028_s1 + $0x178] sm:$0xff]   ;;  %v3797_v54 = vld [vmem:[%s5028_s1 + $0x1a0] sm:$0xff]  }
  0x34   :  { %3182 = vmatprep.subr.bf16.mxu1 %v3766_v56  ;;  %1472 = vmatprep.mubr.bf16.mxu1 %v2962_v57  ;;  %v3798_v56 = vld [vmem:[%s5028_s1 + $0x1e8] sm:$0xff]   ;;  %v97_v57 = vld [vmem:[%s5029_s0 + $0x200] sm:$0xff] }
  0x35   :  { %3291 = vmatpush3.bf16.msra.mxu0 %v3785_v24  ;;  %v90_v24 = vld [vmem:[%s5029_s0 + $0x1c8] sm:$0xff] }
  0x36   :  { %3292 = vmatprep.subr.bf16.mxu0 %v3786_v27  ;;  %v2891_v27 = vcombine.low %v82_v16, %v86_v17  ;;  %v2900_v29 = vcombine.high %v90_v24, %v94_v25 }
  0x37   :  { %3183 = vmatpush3.bf16.msra.mxu1 %v3767_v58  ;;  %v101_v58 = vld [vmem:[%s5029_s0 + $0x220] sm:$0xff] }
  0x38   :  { %3184 = vmatprep.subr.bf16.mxu1 %v3768_v60  ;;  %v70_v60 = vld [vmem:[%s5029_s0 + $0x128] sm:$0xff]  ;;  %v2906_v1 = vcombine.high %v97_v57, %v101_v58  ;;  %v2905_v10 = vcombine.low %v97_v57, %v101_v58  ;;  %v63_v57 = vld [vmem:[%s5029_s0 + $0xf0] sm:$0xff] }
  0x39   :  { %3293 = vmatpush3.bf16.msra.mxu0 %v3788_v32  ;;  %v2876_v2 = vcombine.high %v66_v59, %v70_v60  ;;  %v2875_v11 = vcombine.low %v66_v59, %v70_v60  ;;  %v35_v32 = vld [vmem:[%s5029_s0 + $0x10] sm:$0xff] }
  0x3a   :  { %1377 = vmatmul.mubr.bf16.gmra.mrb[12].mxu0 %v2865_v3  ;;  %1473 = vmatmul.mubr.bf16.gmra.mrb[12].mxu1 %v2961_v4  ;;  %v3801_v3 = vld [vmem:[%s5028_s1 + $0x1b0] sm:$0xff]   ;;  %v3802_v4 = vld [vmem:[%s5028_s1 + $0x1f8] sm:$0xff]  }
  0x3b   :  { %3185 = vmatpush3.bf16.msra.mxu1 %v3769_v5  ;;  %1384 = vmatprep.mubr.bf16.mxu0 %v2874_v6  ;;  %v105_v5 = vld [vmem:[%s5029_s0 + $0x240] sm:$0xff] }
  0x3c   :  { %3186 = vmatprep.subr.bf16.mxu1 %v3770_v7  ;;  %1513 = vmatprep.mubr.bf16.mxu1 %v2844_v8  ;;  %v109_v6 = vld [vmem:[%s5029_s0 + $0x260] sm:$0xff]  ;;  %v74_v7 = vld [vmem:[%s5029_s0 + $0x148] sm:$0xff] }
  0x3d   :  { %3294 = vmatprep.subr.bf16.mxu0 %v3790_v39  ;;  %v78_v8 = vld [vmem:[%s5029_s0 + $0x168] sm:$0xff] }
  0x3e   :  { %3295 = vmatpush3.bf16.msra.mxu0 %v3791_v40  ;;  %v2884_v13 = vcombine.high %v74_v7, %v78_v8  ;;  %v110_v39 = vld [vmem:[%s5029_s0 + $0x268] sm:$0xff]  ;;  %v43_v40 = vld [vmem:[%s5029_s0 + $0x50] sm:$0xff] }
  0x3f   :  { %3187 = vmatpush3.bf16.msra.mxu1 %v3771_v9  ;;  %3296 = vmatprep.subr.bf16.mxu0 %v3792_v41  ;;  %v3803_v9 = vld [vmem:[%s5028_s1 + $0x1b8] sm:$0xff]   ;;  %v47_v41 = vld [vmem:[%s5029_s0 + $0x70] sm:$0xff] }
  0x40   :  { %3396 = vmatprep.subr.bf16.mxu1 %v3772_v12  ;;  %v2914_v12 = vcombine.high %v105_v5, %v109_v6  ;;  %v2854_v45 = vcombine.high %v43_v40, %v47_v41 }
  0x42   :  { %1385 = vmatmul.mubr.bf16.gmra.mrb[16].mxu0 %v2873_v19  ;;  %1514 = vmatmul.mubr.bf16.vlgmr.msra.gmra.mrb[16].mxu1 %v2843_v18  ;;  %v2913_v18 = vcombine.low %v105_v5, %v109_v6  ;;  %v2883_v19 = vcombine.low %v74_v7, %v78_v8  ;;  %v138_v6 = vld [vmem:[%s5029_s0 + $0x348] sm:$0xff]  ;;  %v75_v8 = vld [vmem:[%s5029_s0 + $0x150] sm:$0xff] }
  0x43   :  { %3397 = vmatpush3.bf16.msra.mxu1 %v3773_v20  ;;  %1392 = vmatprep.mubr.bf16.mxu0 %v2882_v21  ;;  %v2922_v20 = vcombine.high %v113_v14, %v117_v15  ;;  %v2892_v21 = vcombine.high %v82_v16, %v86_v17  ;;  %v142_v7 = vld [vmem:[%s5029_s0 + $0x368] sm:$0xff]  ;;  %v83_v16 = vld [vmem:[%s5029_s0 + $0x190] sm:$0xff] }
  0x44   :  { %1521 = vmatprep.mubr.bf16.mxu1 %v2852_v22  ;;  %3398 = vmatprep.subr.bf16.mxu1 %v3774_v23  ;;  %v121_v22 = vld [vmem:[%s5029_s0 + $0x2c0] sm:$0xff]  ;;  %v146_v14 = vld [vmem:[%s5029_s0 + $0x388] sm:$0xff]  ;;  %v87_v17 = vld [vmem:[%s5029_s0 + $0x1b0] sm:$0xff] }
  0x45   :  { %3297 = vmatpush3.bf16.msra.mxu0 %v3793_v47  ;;  %v125_v23 = vld [vmem:[%s5029_s0 + $0x2e0] sm:$0xff]  ;;  %v118_v47 = vld [vmem:[%s5029_s0 + $0x2a8] sm:$0xff] }
  0x46   :  { %3298 = vmatprep.subr.bf16.mxu0 %v3794_v53  ;;  %v2930_v28 = vcombine.high %v121_v22, %v125_v23  ;;  %v150_v15 = vld [vmem:[%s5029_s0 + $0x3a8] sm:$0xff] }
  0x47   :  { %3399 = vmatpush3.bf16.msra.mxu1 %v3775_v30  ;;  %v98_v30 = vld [vmem:[%s5029_s0 + $0x208] sm:$0xff] }
  0x48   :  { %3400 = vmatprep.subr.bf16.mxu1 %v3778_v31  ;;  %v102_v31 = vld [vmem:[%s5029_s0 + $0x228] sm:$0xff] }
  0x49   :  { %3299 = vmatpush3.bf16.msra.mxu0 %v3795_v55  ;;  %v2907_v43 = vcombine.low %v98_v30, %v102_v31  ;;  %v126_v55 = vld [vmem:[%s5029_s0 + $0x2e8] sm:$0xff] }
  0x4a   :  { %1393 = vmatmul.mubr.bf16.gmra.mrb[20].mxu0 %v2881_v33  ;;  %1522 = vmatmul.mubr.bf16.gmra.mrb[20].mxu1 %v2851_v34  ;;  %v39_v33 = vld [vmem:[%s5029_s0 + $0x30] sm:$0xff]  ;;  %v2929_v34 = vcombine.low %v121_v22, %v125_v23  ;;  %v154_v22 = vld [vmem:[%s5029_s0 + $0x3c8] sm:$0xff] }
  0x4b   :  { %1400 = vmatprep.mubr.bf16.mxu0 %v2890_v35  ;;  %1529 = vmatprep.mubr.bf16.mxu1 %v2860_v36  ;;  %v2899_v35 = vcombine.low %v90_v24, %v94_v25  ;;  %v2908_v36 = vcombine.high %v98_v30, %v102_v31  ;;  %v2845_v42 = vcombine.low %v35_v32, %v39_v33  ;;  %v158_v23 = vld [vmem:[%s5029_s0 + $0x3e8] sm:$0xff]  ;;  %v91_v24 = vld [vmem:[%s5029_s0 + $0x1d0] sm:$0xff] }
  0x4c   :  { %3401 = vmatpush3.bf16.msra.mxu1 %v3779_v37  ;;  %v2846_v37 = vcombine.high %v35_v32, %v39_v33  ;;  %v95_v25 = vld [vmem:[%s5029_s0 + $0x1f0] sm:$0xff]  ;;  %v36_v32 = vld [vmem:[%s5029_s0 + $0x18] sm:$0xff] }
  0x4d   :  { %3402 = vmatprep.subr.bf16.mxu1 %v3787_v38  ;;  %v106_v38 = vld [vmem:[%s5029_s0 + $0x248] sm:$0xff]  ;;  %v99_v30 = vld [vmem:[%s5029_s0 + $0x210] sm:$0xff]  ;;  %v40_v33 = vld [vmem:[%s5029_s0 + $0x38] sm:$0xff] }
  0x4e   :  { %v2916_v44 = vcombine.high %v106_v38, %v110_v39  ;;  %v103_v31 = vld [vmem:[%s5029_s0 + $0x230] sm:$0xff] }
  0x50   :  { %3403 = vmatpush3.bf16.msra.mxu1 %v3789_v46  ;;  %v114_v46 = vld [vmem:[%s5029_s0 + $0x288] sm:$0xff] }
  0x51   :  { %3404 = vmatprep.subr.bf16.mxu1 %v3796_v48  ;;  %v51_v48 = vld [vmem:[%s5029_s0 + $0x90] sm:$0xff]  ;;  %v2923_v58 = vcombine.low %v114_v46, %v118_v47 }
  0x52   :  { %1401 = vmatmul.mubr.bf16.gmra.mrb[24].mxu0 %v2889_v49  ;;  %1530 = vmatmul.mubr.bf16.gmra.mrb[24].mxu1 %v2859_v50  ;;  %v55_v49 = vld [vmem:[%s5029_s0 + $0xb0] sm:$0xff]  ;;  %v2915_v50 = vcombine.low %v106_v38, %v110_v39 }
  0x53   :  { %1408 = vmatprep.mubr.bf16.mxu0 %v2898_v51  ;;  %1537 = vmatprep.mubr.bf16.mxu1 %v2868_v52  ;;  %v2853_v51 = vcombine.low %v43_v40, %v47_v41  ;;  %v2924_v52 = vcombine.high %v114_v46, %v118_v47  ;;  %v2862_v53 = vcombine.high %v51_v48, %v55_v49  ;;  %v107_v38 = vld [vmem:[%s5029_s0 + $0x250] sm:$0xff]  ;;  %v44_v40 = vld [vmem:[%s5029_s0 + $0x58] sm:$0xff] }
  0x54   :  { %3405 = vmatpush3.bf16.msra.mxu1 %v3797_v54  ;;  %v122_v54 = vld [vmem:[%s5029_s0 + $0x2c8] sm:$0xff]  ;;  %v2861_v59 = vcombine.low %v51_v48, %v55_v49  ;;  %v111_v39 = vld [vmem:[%s5029_s0 + $0x270] sm:$0xff]  ;;  %v48_v41 = vld [vmem:[%s5029_s0 + $0x78] sm:$0xff] }
  0x55   :  { %3406 = vmatprep.subr.bf16.mxu1 %v3798_v56  ;;  %v59_v56 = vld [vmem:[%s5029_s0 + $0xd0] sm:$0xff]  ;;  %v2932_v60 = vcombine.high %v122_v54, %v126_v55  ;;  %v52_v48 = vld [vmem:[%s5029_s0 + $0x98] sm:$0xff] }
  0x56   :  { %v115_v46 = vld [vmem:[%s5029_s0 + $0x290] sm:$0xff]  ;;  %v56_v49 = vld [vmem:[%s5029_s0 + $0xb8] sm:$0xff] }
  0x57   :  { %v119_v47 = vld [vmem:[%s5029_s0 + $0x2b0] sm:$0xff] }
  0x58   :  { %3407 = vmatpush3.bf16.msra.mxu1 %v3799_v61  ;;  %v2870_v61 = vcombine.high %v59_v56, %v63_v57 }
  0x59   :  { %3408 = vmatprep.subr.bf16.mxu1 %v3800_v62  ;;  %v130_v62 = vld [vmem:[%s5029_s0 + $0x308] sm:$0xff] }
  0x5a   :  { %1409 = vmatmul.mubr.bf16.gmra.mrb[28].mxu0 %v2897_v63  ;;  %1538 = vmatmul.mubr.bf16.gmra.mrb[28].mxu1 %v2867_v0  ;;  %v134_v63 = vld [vmem:[%s5029_s0 + $0x328] sm:$0xff]  ;;  %v67_v0 = vld [vmem:[%s5029_s0 + $0x110] sm:$0xff] }
  0x5b   :  { %1416 = vmatprep.mubr.bf16.mxu0 %v2906_v1  ;;  %1545 = vmatprep.mubr.bf16.mxu1 %v2876_v2  ;;  %v71_v1 = vld [vmem:[%s5029_s0 + $0x130] sm:$0xff]  ;;  %v2931_v2 = vcombine.low %v122_v54, %v126_v55 }
  0x5c   :  { %3409 = vmatpush3.bf16.msra.mxu1 %v3801_v3  ;;  %v2869_v3 = vcombine.low %v59_v56, %v63_v57  ;;  %v2878_v5 = vcombine.high %v67_v0, %v71_v1  ;;  %v123_v54 = vld [vmem:[%s5029_s0 + $0x2d0] sm:$0xff]  ;;  %v60_v56 = vld [vmem:[%s5029_s0 + $0xd8] sm:$0xff] }
  0x5d   :  { %3410 = vmatprep.subr.bf16.mxu1 %v3802_v4  ;;  %v2940_v4 = vcombine.high %v130_v62, %v134_v63  ;;  %v127_v55 = vld [vmem:[%s5029_s0 + $0x2f0] sm:$0xff]  ;;  %v64_v57 = vld [vmem:[%s5029_s0 + $0xf8] sm:$0xff] }
  0x60   :  { %3411 = vmatpush3.bf16.msra.mxu1 %v3803_v9  ;;  %v79_v9 = vld [vmem:[%s5029_s0 + $0x170] sm:$0xff] }
  0x62   :  { %1417 = vmatmul.mubr.bf16.gmra.mrb[32].mxu0 %v2905_v10  ;;  %1546 = vmatmul.mubr.bf16.gmra.mrb[32].mxu1 %v2875_v11  ;;  %v2939_v10 = vcombine.low %v130_v62, %v134_v63  ;;  %v2877_v11 = vcombine.low %v67_v0, %v71_v1  ;;  %v131_v62 = vld [vmem:[%s5029_s0 + $0x310] sm:$0xff]  ;;  %v68_v0 = vld [vmem:[%s5029_s0 + $0x118] sm:$0xff] }
  0x63   :  { %1424 = vmatprep.mubr.bf16.mxu0 %v2914_v12  ;;  %1553 = vmatprep.mubr.bf16.mxu1 %v2884_v13  ;;  %v2948_v12 = vcombine.high %v138_v6, %v142_v7  ;;  %v2886_v13 = vcombine.high %v75_v8, %v79_v9  ;;  %v135_v63 = vld [vmem:[%s5029_s0 + $0x330] sm:$0xff]  ;;  %v72_v1 = vld [vmem:[%s5029_s0 + $0x138] sm:$0xff] }
  0x6a   :  { %1425 = vmatmul.mubr.bf16.gmra.mrb[36].mxu0 %v2913_v18  ;;  %1554 = vmatmul.mubr.bf16.gmra.mrb[36].mxu1 %v2883_v19  ;;  %v2947_v18 = vcombine.low %v138_v6, %v142_v7  ;;  %v2885_v19 = vcombine.low %v75_v8, %v79_v9  ;;  %v139_v6 = vld [vmem:[%s5029_s0 + $0x350] sm:$0xff]  ;;  %v76_v8 = vld [vmem:[%s5029_s0 + $0x158] sm:$0xff] }
  0x6b   :  { %1432 = vmatprep.mubr.bf16.mxu0 %v2922_v20  ;;  %1561 = vmatprep.mubr.bf16.mxu1 %v2892_v21  ;;  %v2956_v20 = vcombine.high %v146_v14, %v150_v15  ;;  %v2894_v21 = vcombine.high %v83_v16, %v87_v17  ;;  %v143_v7 = vld [vmem:[%s5029_s0 + $0x370] sm:$0xff]  ;;  %v80_v9 = vld [vmem:[%s5029_s0 + $0x178] sm:$0xff] }
  0x72   :  { %1433 = vmatmul.mubr.bf16.gmra.mrb[40].mxu0 %v2921_v26  ;;  %1562 = vmatmul.mubr.bf16.gmra.mrb[40].mxu1 %v2891_v27  ;;  %v2955_v26 = vcombine.low %v146_v14, %v150_v15  ;;  %v2893_v27 = vcombine.low %v83_v16, %v87_v17  ;;  %v147_v14 = vld [vmem:[%s5029_s0 + $0x390] sm:$0xff]  ;;  %v84_v16 = vld [vmem:[%s5029_s0 + $0x198] sm:$0xff] }
  0x73   :  { %1440 = vmatprep.mubr.bf16.mxu0 %v2930_v28  ;;  %1569 = vmatprep.mubr.bf16.mxu1 %v2900_v29  ;;  %v2964_v28 = vcombine.high %v154_v22, %v158_v23  ;;  %v2902_v29 = vcombine.high %v91_v24, %v95_v25  ;;  %v151_v15 = vld [vmem:[%s5029_s0 + $0x3b0] sm:$0xff]  ;;  %v88_v17 = vld [vmem:[%s5029_s0 + $0x1b8] sm:$0xff] }
  0x7a   :  { %1441 = vmatmul.mubr.bf16.gmra.mrb[44].mxu0 %v2929_v34  ;;  %1570 = vmatmul.mubr.bf16.gmra.mrb[44].mxu1 %v2899_v35  ;;  %v2963_v34 = vcombine.low %v154_v22, %v158_v23  ;;  %v2901_v35 = vcombine.low %v91_v24, %v95_v25  ;;  %v2896_v22 = vcombine.high %v84_v16, %v88_v17  ;;  %v155_v23 = vld [vmem:[%s5029_s0 + $0x3d0] sm:$0xff]  ;;  %v92_v25 = vld [vmem:[%s5029_s0 + $0x1d8] sm:$0xff] }
  0x7b   :  { %1577 = vmatprep.mubr.bf16.mxu1 %v2908_v36  ;;  %1674 = vmatprep.mubr.bf16.mxu0 %v2846_v37  ;;  %v2910_v36 = vcombine.high %v99_v30, %v103_v31  ;;  %v2848_v37 = vcombine.high %v36_v32, %v40_v33  ;;  %v159_v24 = vld [vmem:[%s5029_s0 + $0x3f0] sm:$0xff] }
  0x82   :  { %1578 = vmatmul.mubr.bf16.gmra.mrb[48].mxu1 %v2907_v43  ;;  %1675 = vmatmul.mubr.bf16.vlgmr.msra.gmra.mrb[48].mxu0 %v2845_v42  ;;  %v2847_v42 = vcombine.low %v36_v32, %v40_v33  ;;  %v2909_v43 = vcombine.low %v99_v30, %v103_v31  ;;  %v3805_v31 = vld [vmem:[%s5030_s3 + $0x8] sm:$0xff]   ;;  %v100_v32 = vld [vmem:[%s5029_s0 + $0x218] sm:$0xff] }
  0x83   :  { %1585 = vmatprep.mubr.bf16.mxu1 %v2916_v44  ;;  %1682 = vmatprep.mubr.bf16.mxu0 %v2854_v45  ;;  %v2918_v44 = vcombine.high %v107_v38, %v111_v39  ;;  %v2856_v45 = vcombine.high %v44_v40, %v48_v41  ;;  %v104_v33 = vld [vmem:[%s5029_s0 + $0x238] sm:$0xff] }
  0x8a   :  { %1586 = vmatmul.mubr.bf16.gmra.mrb[52].mxu1 %v2915_v50  ;;  %1683 = vmatmul.mubr.bf16.gmra.mrb[52].mxu0 %v2853_v51  ;;  %v2917_v50 = vcombine.low %v107_v38, %v111_v39  ;;  %v2855_v51 = vcombine.low %v44_v40, %v48_v41 }
  0x8b   :  { %1593 = vmatprep.mubr.bf16.mxu1 %v2924_v52  ;;  %1690 = vmatprep.mubr.bf16.mxu0 %v2862_v53  ;;  %v2926_v52 = vcombine.high %v115_v46, %v119_v47  ;;  %v2864_v53 = vcombine.high %v52_v48, %v56_v49 }
  0x92   :  { %1594 = vmatmul.mubr.bf16.gmra.mrb[56].mxu1 %v2923_v58  ;;  %1691 = vmatmul.mubr.bf16.gmra.mrb[56].mxu0 %v2861_v59  ;;  %v2925_v58 = vcombine.low %v115_v46, %v119_v47  ;;  %v2863_v59 = vcombine.low %v52_v48, %v56_v49  ;;  %v108_v49 = vld [vmem:[%s5029_s0 + $0x258] sm:$0xff] }
  0x93   :  { %1601 = vmatprep.mubr.bf16.mxu1 %v2932_v60  ;;  %1698 = vmatprep.mubr.bf16.mxu0 %v2870_v61  ;;  %v2934_v60 = vcombine.high %v123_v54, %v127_v55  ;;  %v2872_v61 = vcombine.high %v60_v56, %v64_v57 }
  0x9a   :  { %1602 = vmatmul.mubr.bf16.gmra.mrb[60].mxu1 %v2931_v2  ;;  %1699 = vmatmul.mubr.bf16.gmra.mrb[60].mxu0 %v2869_v3  ;;  %v2933_v2 = vcombine.low %v123_v54, %v127_v55  ;;  %v2871_v3 = vcombine.low %v60_v56, %v64_v57  ;;  %v2911_v54 = vcombine.low %v100_v32, %v104_v33 }
  0x9b   :  { %1609 = vmatprep.mubr.bf16.mxu1 %v2940_v4  ;;  %1706 = vmatprep.mubr.bf16.mxu0 %v2878_v5  ;;  %v2942_v4 = vcombine.high %v131_v62, %v135_v63  ;;  %v2880_v5 = vcombine.high %v68_v0, %v72_v1 }
  0xa2   :  { %1610 = vmatmul.mubr.bf16.gmra.mrb[64].mxu1 %v2939_v10  ;;  %1707 = vmatmul.mubr.bf16.gmra.mrb[64].mxu0 %v2877_v11  ;;  %v2941_v10 = vcombine.low %v131_v62, %v135_v63  ;;  %v2879_v11 = vcombine.low %v68_v0, %v72_v1  ;;  %v3806_v1 = vld [vmem:[%s5030_s3 + $0x10] sm:$0xff]  }
  0xa3   :  { %1617 = vmatprep.mubr.bf16.mxu1 %v2948_v12  ;;  %1714 = vmatprep.mubr.bf16.mxu0 %v2886_v13  ;;  %v2950_v12 = vcombine.high %v139_v6, %v143_v7  ;;  %v2888_v13 = vcombine.high %v76_v8, %v80_v9 }
  0xaa   :  { %1618 = vmatmul.mubr.bf16.gmra.mrb[68].mxu1 %v2947_v18  ;;  %1715 = vmatmul.mubr.bf16.gmra.mrb[68].mxu0 %v2885_v19  ;;  %v3804_v18 = vld [vmem:[%s5030_s3] sm:$0xff]   ;;  %v2949_v19 = vcombine.low %v139_v6, %v143_v7 }
  0xab   :  { %1625 = vmatprep.mubr.bf16.mxu1 %v2956_v20  ;;  %1722 = vmatprep.mubr.bf16.mxu0 %v2894_v21  ;;  %v2887_v20 = vcombine.low %v76_v8, %v80_v9  ;;  %v2958_v21 = vcombine.high %v147_v14, %v151_v15 }
  0xac   :  { %3580 = vmatprep.subr.bf16.mxu0 %v3804_v18 }
  0xad   :  { %3581 = vmatpush3.bf16.msra.mxu0 %v3804_v18  ;;  %v124_v18 = vld [vmem:[%s5029_s0 + $0x2d8] sm:$0xff] }
  0xae   :  { %3582 = vmatprep.subr.bf16.mxu0 %v3805_v31 }
  0xb1   :  { %3583 = vmatpush3.bf16.msra.mxu0 %v3805_v31 }
  0xb2   :  { %1626 = vmatmul.mubr.bf16.gmra.mrb[72].mxu1 %v2955_v26  ;;  %1723 = vmatmul.mubr.bf16.gmra.mrb[72].mxu0 %v2893_v27  ;;  %v96_v26 = vld [vmem:[%s5029_s0 + $0x1f8] sm:$0xff]  ;;  %v2957_v27 = vcombine.low %v147_v14, %v151_v15 }
  0xb3   :  { %1633 = vmatprep.mubr.bf16.mxu1 %v2964_v28  ;;  %1730 = vmatprep.mubr.bf16.mxu0 %v2902_v29  ;;  %v2895_v28 = vcombine.low %v84_v16, %v88_v17  ;;  %v2966_v29 = vcombine.high %v155_v23, %v159_v24  ;;  %v2904_v30 = vcombine.high %v92_v25, %v96_v26 }
  0xb4   :  { %v2903_v38 = vcombine.low %v92_v25, %v96_v26  ;;  %3584 = vmatprep.subr.bf16.mxu0 %v3806_v1 }
  0xb5   :  { %3585 = vmatpush3.bf16.msra.mxu0 %v3806_v1  ;;  %v144_v1 = vld [vmem:[%s5029_s0 + $0x378] sm:$0xff] }
  0xba   :  { %1634 = vmatmul.mubr.bf16.gmra.mrb[76].mxu1 %v2963_v34  ;;  %1731 = vmatmul.mubr.bf16.gmra.mrb[76].mxu0 %v2901_v35 }
  0xbb   :  { %1738 = vmatprep.mubr.bf16.mxu0 %v2910_v36  ;;  %1835 = vmatprep.mubr.bf16.mxu1 %v2848_v37  ;;  %v2965_v37 = vcombine.low %v155_v23, %v159_v24 }
  0xc2   :  { %1739 = vmatmul.mubr.bf16.gmra.mrb[80].mxu0 %v2909_v43  ;;  %1836 = vmatmul.mubr.bf16.vlgmr.msra.gmra.mrb[80].mxu1 %v2847_v42  ;;  %v2912_v42 = vcombine.high %v100_v32, %v104_v33 }
  0xc3   :  { %1746 = vmatprep.mubr.bf16.mxu0 %v2918_v44  ;;  %1843 = vmatprep.mubr.bf16.mxu1 %v2856_v45 }
  0xca   :  { %1747 = vmatmul.mubr.bf16.gmra.mrb[84].mxu0 %v2917_v50  ;;  %1844 = vmatmul.mubr.bf16.gmra.mrb[84].mxu1 %v2855_v51  ;;  %v112_v50 = vld [vmem:[%s5029_s0 + $0x278] sm:$0xff] }
  0xcb   :  { %1754 = vmatprep.mubr.bf16.mxu0 %v2926_v52  ;;  %1851 = vmatprep.mubr.bf16.mxu1 %v2864_v53  ;;  %v2919_v7 = vcombine.low %v108_v49, %v112_v50 }
  0xd2   :  { %1755 = vmatmul.mubr.bf16.gmra.mrb[88].mxu0 %v2925_v58  ;;  %1852 = vmatmul.mubr.bf16.gmra.mrb[88].mxu1 %v2863_v59  ;;  %v2920_v58 = vcombine.high %v108_v49, %v112_v50 }
  0xd3   :  { %1762 = vmatprep.mubr.bf16.mxu0 %v2934_v60  ;;  %1859 = vmatprep.mubr.bf16.mxu1 %v2872_v61 }
  0xda   :  { %1763 = vmatmul.mubr.bf16.gmra.mrb[92].mxu0 %v2933_v2  ;;  %1860 = vmatmul.mubr.bf16.gmra.mrb[92].mxu1 %v2871_v3  ;;  %v116_v2 = vld [vmem:[%s5029_s0 + $0x298] sm:$0xff] }
  0xdb   :  { %1770 = vmatprep.mubr.bf16.mxu0 %v2942_v4  ;;  %1867 = vmatprep.mubr.bf16.mxu1 %v2880_v5  ;;  %v120_v3 = vld [vmem:[%s5029_s0 + $0x2b8] sm:$0xff] }
  0xdc   :  { %v2927_v23 = vcombine.low %v116_v2, %v120_v3 }
  0xe2   :  { %1771 = vmatmul.mubr.bf16.gmra.mrb[96].mxu0 %v2941_v10  ;;  %1868 = vmatmul.mubr.bf16.gmra.mrb[96].mxu1 %v2879_v11  ;;  %v2928_v11 = vcombine.high %v116_v2, %v120_v3 }
  0xe3   :  { %1778 = vmatprep.mubr.bf16.mxu0 %v2950_v12  ;;  %1875 = vmatprep.mubr.bf16.mxu1 %v2888_v13 }
  0xea   :  { %1779 = vmatmul.mubr.bf16.gmra.mrb[100].mxu0 %v2949_v19  ;;  %1876 = vmatmul.mubr.bf16.gmra.mrb[100].mxu1 %v2887_v20  ;;  %v128_v19 = vld [vmem:[%s5029_s0 + $0x2f8] sm:$0xff] }
  0xeb   :  { %1786 = vmatprep.mubr.bf16.mxu0 %v2958_v21  ;;  %1883 = vmatprep.mubr.bf16.mxu1 %v2896_v22 }
  0xf2   :  { %1787 = vmatmul.mubr.bf16.gmra.mrb[104].mxu0 %v2957_v27  ;;  %1884 = vmatmul.mubr.bf16.gmra.mrb[104].mxu1 %v2895_v28  ;;  %v2936_v27 = vcombine.high %v124_v18, %v128_v19 }
  0xf3   :  { %1794 = vmatprep.mubr.bf16.mxu0 %v2966_v29  ;;  %1891 = vmatprep.mubr.bf16.mxu1 %v2904_v30 }
  0xf5   :  { %v3148_v34 = vpop.f32.mrb[0].mxu1  ;;  %v3076_v35 = vpop.f32.mrb[0].mxu0 }
  0xf6   :  { %v3149_v36 = vpop.f32.mrb[1].mxu1  ;;  %v3077_v39 = vpop.f32.mrb[1].mxu0 }
  0xf7   :  { %v4418_v40 = vadd.f32 %v3149_v36, %v3148_v34  ;;  %v3151_v41 = vpop.f32.mrb[2].mxu1  ;;  %v4420_v43 = vadd.f32 %v3077_v39, %v3076_v35  ;;  %v3079_v44 = vpop.f32.mrb[2].mxu0  ;;  %v3807_v34 = vld [vmem:[%s5030_s3 + $0x18] sm:$0xff]   ;;  %v4477_v35 = vld [vmem:[%s5031_s2] ss:$0 sm:$0xff] }
  0xf8   :  { %v3152_v45 = vpop.f32.mrb[3].mxu1  ;;  %v3080_v46 = vpop.f32.mrb[3].mxu0  ;;  %v132_v36 = vld [vmem:[%s5029_s0 + $0x318] sm:$0xff]  ;;  %3586 = vmatprep.subr.bf16.mxu0 %v3807_v34 }
  0xf9   :  { %v4422_v47 = vadd.f32 %v3152_v45, %v3151_v41  ;;  %v4424_v48 = vadd.f32 %v3080_v46, %v3079_v44  ;;  %v2935_v44 = vcombine.low %v124_v18, %v128_v19  ;;  %3587 = vmatpush3.bf16.msra.mxu0 %v3807_v34 }
  0xfa   :  { %1795 = vmatmul.mubr.bf16.gmra.mrb[108].mxu0 %v2965_v37  ;;  %1892 = vmatmul.mubr.bf16.gmra.mrb[108].mxu1 %v2903_v38  ;;  %v136_v37 = vld [vmem:[%s5029_s0 + $0x338] sm:$0xff]  ;;  %v1355_v38 = vadd.f32 %v4420_v43, %v4477_v35  ;;  %v3808_v43 = vld [vmem:[%s5030_s3 + $0x20] sm:$0xff]  }
  0xfb   :  { %1899 = vmatprep.mubr.bf16.mxu1 %v2912_v42  ;;  %v1358_v46 = vadd.f32 %v4424_v48, %v4477_v35  ;;  %3588 = vmatprep.subr.bf16.mxu0 %v3808_v43 }
  0xfd   :  { %v3154_v51 = vpop.f32.mrb[4].mxu1  ;;  %v3082_v52 = vpop.f32.mrb[4].mxu0  ;;  %3589 = vmatpush3.bf16.msra.mxu0 %v3808_v43 }
  0xfe   :  { %v3155_v53 = vpop.f32.mrb[5].mxu1  ;;  %v3083_v55 = vpop.f32.mrb[5].mxu0 }
  0xff   :  { %v4432_v56 = vadd.f32 %v3155_v53, %v3154_v51  ;;  %v3157_v57 = vpop.f32.mrb[6].mxu1  ;;  %v4434_v59 = vadd.f32 %v3083_v55, %v3082_v52  ;;  %v3085_v60 = vpop.f32.mrb[6].mxu0  ;;  %v2944_v51 = vcombine.high %v132_v36, %v136_v37 }
 0x100   :  { %v3158_v61 = vpop.f32.mrb[7].mxu1  ;;  %v3086_v62 = vpop.f32.mrb[7].mxu0 }
 0x101   :  { %v4436_v63 = vadd.f32 %v3158_v61, %v3157_v57  ;;  %v4438_v0 = vadd.f32 %v3086_v62, %v3085_v60  ;;  %v3809_v61 = vld [vmem:[%s5030_s3 + $0x28] sm:$0xff]   ;;  %v140_v62 = vld [vmem:[%s5029_s0 + $0x358] sm:$0xff]  ;;  %v1363_v2 = vadd.f32 %v4434_v59, %v4477_v35  ;;  %v3810_v59 = vld [vmem:[%s5030_s3 + $0x30] sm:$0xff]  }
 0x102   :  { %1900 = vmatmul.mubr.bf16.gmra.mrb[112].mxu1 %v2911_v54  ;;  %3590 = vmatprep.subr.bf16.mxu0 %v3809_v61  ;;  %v2951_v34 = vcombine.low %v140_v62, %v144_v1 }
 0x103   :  { %1907 = vmatprep.mubr.bf16.mxu1 %v2920_v58  ;;  %3591 = vmatpush3.bf16.msra.mxu0 %v3809_v61 }
 0x104   :  { %3592 = vmatprep.subr.bf16.mxu0 %v3810_v59 }
 0x105   :  { %v3160_v4 = vpop.f32.mrb[8].mxu1  ;;  %v3088_v5 = vpop.f32.mrb[8].mxu0 }
 0x106   :  { %v3161_v6 = vpop.f32.mrb[9].mxu1  ;;  %v3089_v8 = vpop.f32.mrb[9].mxu0 }
 0x107   :  { %v4449_v9 = vadd.f32 %v3161_v6, %v3160_v4  ;;  %v3163_v10 = vpop.f32.mrb[10].mxu1  ;;  %v4451_v12 = vadd.f32 %v3089_v8, %v3088_v5  ;;  %v3091_v13 = vpop.f32.mrb[10].mxu0  ;;  %v2943_v6 = vcombine.low %v132_v36, %v136_v37  ;;  %v1366_v8 = vadd.f32 %v4438_v0, %v4477_v35  ;;  %3593 = vmatpush3.bf16.msra.mxu0 %v3810_v59 }
 0x108   :  { %v3164_v14 = vpop.f32.mrb[11].mxu1  ;;  %v3092_v15 = vpop.f32.mrb[11].mxu0 }
 0x109   :  { %v4453_v16 = vadd.f32 %v3164_v14, %v3163_v10  ;;  %v4455_v17 = vadd.f32 %v3092_v15, %v3091_v13  ;;  %v2952_v13 = vcombine.high %v140_v62, %v144_v1 }
 0x10a   :  { %1908 = vmatmul.mubr.bf16.gmra.mrb[116].mxu1 %v2919_v7 }
 0x10b   :  { %1915 = vmatprep.mubr.bf16.mxu1 %v2928_v11  ;;  %v1374_v37 = vadd.f32 %v4455_v17, %v4477_v35  ;;  %v156_v17 = vld [vmem:[%s5029_s0 + $0x3d8] sm:$0xff] }
 0x10d   :  { %v3166_v20 = vpop.f32.mrb[12].mxu1  ;;  %v3094_v21 = vpop.f32.mrb[12].mxu0 }
 0x10e   :  { %v3167_v22 = vpop.f32.mrb[13].mxu1  ;;  %v3095_v24 = vpop.f32.mrb[13].mxu0 }
 0x10f   :  { %v4463_v25 = vadd.f32 %v3167_v22, %v3166_v20  ;;  %v3169_v26 = vpop.f32.mrb[14].mxu1  ;;  %v4465_v28 = vadd.f32 %v3095_v24, %v3094_v21  ;;  %v3097_v29 = vpop.f32.mrb[14].mxu0  ;;  %v148_v24 = vld [vmem:[%s5029_s0 + $0x398] sm:$0xff] }
 0x110   :  { %v3170_v30 = vpop.f32.mrb[15].mxu1  ;;  %v3098_v31 = vpop.f32.mrb[15].mxu0 }
 0x111   :  { %v4467_v32 = vadd.f32 %v3170_v30, %v3169_v26  ;;  %v4469_v33 = vadd.f32 %v3098_v31, %v3097_v29  ;;  %v152_v26 = vld [vmem:[%s5029_s0 + $0x3b8] sm:$0xff]  ;;  %v1379_v43 = vadd.f32 %v4465_v28, %v4477_v35 }
 0x112   :  { %1916 = vmatmul.mubr.bf16.gmra.mrb[120].mxu1 %v2927_v23  ;;  %v3811_v23 = vld [vmem:[%s5030_s3 + $0x38] sm:$0xff]   ;;  %v2959_v61 = vcombine.low %v148_v24, %v152_v26 }
 0x113   :  { %1923 = vmatprep.mubr.bf16.mxu1 %v2936_v27  ;;  %v1371_v27 = vadd.f32 %v4451_v12, %v4477_v35  ;;  %3594 = vmatprep.subr.bf16.mxu0 %v3811_v23  ;;  %v1382_v1 = vadd.f32 %v4469_v33, %v4477_v35 }
 0x114   :  { %3595 = vmatpush3.bf16.msra.mxu0 %v3811_v23 }
 0x115   :  { %v3188_v39 = vpop.f32.mrb[16].mxu1  ;;  %v3100_v41 = vpop.f32.mrb[16].mxu0 }
 0x116   :  { %v3189_v42 = vpop.f32.mrb[17].mxu1  ;;  %v3101_v45 = vpop.f32.mrb[17].mxu0 }
 0x117   :  { %v3190_v49 = vadd.f32 %v3189_v42, %v3188_v39  ;;  %v3191_v50 = vpop.f32.mrb[18].mxu1  ;;  %v4489_v52 = vadd.f32 %v3101_v45, %v3100_v41  ;;  %v3103_v53 = vpop.f32.mrb[18].mxu0  ;;  %v2960_v41 = vcombine.high %v148_v24, %v152_v26 }
 0x118   :  { %v3192_v54 = vpop.f32.mrb[19].mxu1  ;;  %v3104_v55 = vpop.f32.mrb[19].mxu0 }
 0x119   :  { %v4494_v57 = vadd.f32 %v3190_v49, %v1355_v38  ;;  %v3193_v58 = vadd.f32 %v3192_v54, %v3191_v50  ;;  %v4496_v60 = vadd.f32 %v3104_v55, %v3103_v53  ;;  %v160_v53 = vld [vmem:[%s5029_s0 + $0x3f8] sm:$0xff] }
 0x11a   :  { %1924 = vmatmul.mubr.bf16.gmra.mrb[124].mxu1 %v2935_v44 }
 0x11b   :  { %v4498_v48 = vadd.f32 %v3193_v58, %v1358_v46  ;;  %1931 = vmatprep.mubr.bf16.mxu1 %v2944_v51  ;;  %v1390_v23 = vadd.f32 %v4496_v60, %v4477_v35 }
 0x11d   :  { %v3194_v3 = vpop.f32.mrb[20].mxu1  ;;  %v3106_v4 = vpop.f32.mrb[20].mxu0 }
 0x11e   :  { %v3195_v5 = vpop.f32.mrb[21].mxu1  ;;  %v3107_v7 = vpop.f32.mrb[21].mxu0 }
 0x11f   :  { %v3196_v10 = vadd.f32 %v3195_v5, %v3194_v3  ;;  %v3197_v11 = vpop.f32.mrb[22].mxu1  ;;  %v4513_v14 = vadd.f32 %v3107_v7, %v3106_v4  ;;  %v3109_v15 = vpop.f32.mrb[22].mxu0  ;;  %v2968_v4 = vcombine.high %v156_v17, %v160_v53 }
 0x120   :  { %v3198_v18 = vpop.f32.mrb[23].mxu1  ;;  %v3110_v19 = vpop.f32.mrb[23].mxu0 }
 0x121   :  { %v4518_v20 = vadd.f32 %v3196_v10, %v1363_v2  ;;  %v3199_v21 = vadd.f32 %v3198_v18, %v3197_v11  ;;  %v4520_v22 = vadd.f32 %v3110_v19, %v3109_v15  ;;  %v1387_v15 = vadd.f32 %v4489_v52, %v4477_v35 }
 0x122   :  { %1932 = vmatmul.mubr.bf16.gmra.mrb[128].mxu1 %v2943_v6  ;;  %v2967_v19 = vcombine.low %v156_v17, %v160_v53 }
 0x123   :  { %v4522_v0 = vadd.f32 %v3199_v21, %v1366_v8  ;;  %1939 = vmatprep.mubr.bf16.mxu1 %v2952_v13 }
 0x125   :  { %v3200_v29 = vpop.f32.mrb[24].mxu1  ;;  %v3112_v30 = vpop.f32.mrb[24].mxu0 }
 0x126   :  { %v3201_v31 = vpop.f32.mrb[25].mxu1  ;;  %v3113_v36 = vpop.f32.mrb[25].mxu0 }
 0x127   :  { %v3202_v38 = vadd.f32 %v3201_v31, %v3200_v29  ;;  %v3203_v39 = vpop.f32.mrb[26].mxu1  ;;  %v4537_v42 = vadd.f32 %v3113_v36, %v3112_v30  ;;  %v3115_v44 = vpop.f32.mrb[26].mxu0 }
 0x128   :  { %v3204_v45 = vpop.f32.mrb[27].mxu1  ;;  %v3116_v46 = vpop.f32.mrb[27].mxu0 }
 0x129   :  { %v4539_v49 = vadd.f32 %v3202_v38, %v1371_v27  ;;  %v3205_v12 = vadd.f32 %v3204_v45, %v3203_v39  ;;  %v4541_v50 = vadd.f32 %v3116_v46, %v3115_v44  ;;  %v1395_v38 = vadd.f32 %v4513_v14, %v4477_v35 }
 0x12a   :  { %1940 = vmatmul.mubr.bf16.gmra.mrb[132].mxu1 %v2951_v34  ;;  %v1398_v45 = vadd.f32 %v4520_v22, %v4477_v35  ;;  %v1403_v14 = vadd.f32 %v4537_v42, %v4477_v35 }
 0x12b   :  { %v4543_v51 = vadd.f32 %v3205_v12, %v1374_v37  ;;  %1947 = vmatprep.mubr.bf16.mxu1 %v2960_v41  ;;  %v1406_v22 = vadd.f32 %v4541_v50, %v4477_v35 }
 0x12d   :  { %v3206_v54 = vpop.f32.mrb[28].mxu1  ;;  %v3118_v55 = vpop.f32.mrb[28].mxu0 }
 0x12e   :  { %v3207_v58 = vpop.f32.mrb[29].mxu1  ;;  %v3119_v62 = vpop.f32.mrb[29].mxu0 }
 0x12f   :  { %v3208_v2 = vadd.f32 %v3207_v58, %v3206_v54  ;;  %v3209_v3 = vpop.f32.mrb[30].mxu1  ;;  %v3120_v5 = vadd.f32 %v3119_v62, %v3118_v55  ;;  %v3121_v6 = vpop.f32.mrb[30].mxu0 }
 0x130   :  { %v3210_v7 = vpop.f32.mrb[31].mxu1  ;;  %v3122_v8 = vpop.f32.mrb[31].mxu0 }
 0x131   :  { %v4555_v10 = vadd.f32 %v3208_v2, %v1379_v43  ;;  %v3211_v11 = vadd.f32 %v3210_v7, %v3209_v3  ;;  %v3123_v13 = vadd.f32 %v3122_v8, %v3121_v6  ;;  %v1411_v42 = vadd.f32 %v3120_v5, %v4477_v35 }
 0x132   :  { %1948 = vmatmul.mubr.bf16.gmra.mrb[136].mxu1 %v2959_v61 }
 0x133   :  { %v4557_v28 = vadd.f32 %v3211_v11, %v1382_v1  ;;  %1955 = vmatprep.mubr.bf16.mxu1 %v2968_v4  ;;  %v1414_v50 = vadd.f32 %v3123_v13, %v4477_v35 }
 0x135   :  { %v3212_v59 = vpop.f32.mrb[32].mxu1  ;;  %v3124_v33 = vpop.f32.mrb[32].mxu0 }
 0x136   :  { %v3213_v18 = vpop.f32.mrb[33].mxu1  ;;  %v3125_v21 = vpop.f32.mrb[33].mxu0 }
 0x137   :  { %v3214_v24 = vadd.f32 %v3213_v18, %v3212_v59  ;;  %v3215_v26 = vpop.f32.mrb[34].mxu1  ;;  %v3126_v27 = vadd.f32 %v3125_v21, %v3124_v33  ;;  %v3127_v29 = vpop.f32.mrb[34].mxu0 }
 0x138   :  { %v3216_v30 = vpop.f32.mrb[35].mxu1  ;;  %v3128_v31 = vpop.f32.mrb[35].mxu0 }
 0x139   :  { %v4563_v34 = vadd.f32 %v3214_v24, %v1387_v15  ;;  %v3217_v36 = vadd.f32 %v3216_v30, %v3215_v26  ;;  %v3129_v37 = vadd.f32 %v3128_v31, %v3127_v29  ;;  %v1419_v5 = vadd.f32 %v3126_v27, %v4477_v35 }
 0x13a   :  { %1956 = vmatmul.mubr.bf16.gmra.mrb[140].mxu1 %v2967_v19 }
 0x13b   :  { %v4565_v52 = vadd.f32 %v3217_v36, %v1390_v23  ;;  %v1422_v13 = vadd.f32 %v3129_v37, %v4477_v35 }
 0x13d   :  { %v3218_v39 = vpop.f32.mrb[36].mxu1  ;;  %v3130_v41 = vpop.f32.mrb[36].mxu0 }
 0x13e   :  { %v3219_v44 = vpop.f32.mrb[37].mxu1  ;;  %v3131_v60 = vpop.f32.mrb[37].mxu0 }
 0x13f   :  { %v3220_v46 = vadd.f32 %v3219_v44, %v3218_v39  ;;  %v3221_v12 = vpop.f32.mrb[38].mxu1  ;;  %v3132_v17 = vadd.f32 %v3131_v60, %v3130_v41  ;;  %v3133_v53 = vpop.f32.mrb[38].mxu0 }
 0x140   :  { %v3222_v43 = vpop.f32.mrb[39].mxu1  ;;  %v3134_v54 = vpop.f32.mrb[39].mxu0 }
 0x141   :  { %v4571_v55 = vadd.f32 %v3220_v46, %v1395_v38  ;;  %v3223_v58 = vadd.f32 %v3222_v43, %v3221_v12  ;;  %v3135_v61 = vadd.f32 %v3134_v54, %v3133_v53  ;;  %v1427_v37 = vadd.f32 %v3132_v17, %v4477_v35 }
 0x143   :  { %v4573_v62 = vadd.f32 %v3223_v58, %v1398_v45 }
 0x145   :  { %v3224_v1 = vpop.f32.mrb[40].mxu1  ;;  %v3136_v2 = vpop.f32.mrb[40].mxu0 }
 0x146   :  { %v3225_v3 = vpop.f32.mrb[41].mxu1  ;;  %v3137_v4 = vpop.f32.mrb[41].mxu0 }
 0x147   :  { %v3226_v6 = vadd.f32 %v3225_v3, %v3224_v1  ;;  %v3227_v7 = vpop.f32.mrb[42].mxu1  ;;  %v3138_v8 = vadd.f32 %v3137_v4, %v3136_v2  ;;  %v3139_v11 = vpop.f32.mrb[42].mxu0 }
 0x148   :  { %v3228_v15 = vpop.f32.mrb[43].mxu1  ;;  %v3140_v59 = vpop.f32.mrb[43].mxu0 }
 0x149   :  { %v4579_v33 = vadd.f32 %v3226_v6, %v1403_v14  ;;  %v3229_v18 = vadd.f32 %v3228_v15, %v3227_v7  ;;  %v3141_v19 = vadd.f32 %v3140_v59, %v3139_v11 }
 0x14b   :  { %v4581_v21 = vadd.f32 %v3229_v18, %v1406_v22 }
 0x14d   :  { %v3230_v23 = vpop.f32.mrb[44].mxu1  ;;  %v3142_v24 = vpop.f32.mrb[44].mxu0 }
 0x14e   :  { %v3231_v26 = vpop.f32.mrb[45].mxu1  ;;  %v3143_v29 = vpop.f32.mrb[45].mxu0 }
 0x14f   :  { %v3232_v30 = vadd.f32 %v3231_v26, %v3230_v23  ;;  %v3233_v31 = vpop.f32.mrb[46].mxu1  ;;  %v3144_v36 = vadd.f32 %v3143_v29, %v3142_v24  ;;  %v3145_v38 = vpop.f32.mrb[46].mxu0  ;;  %v1430_v24 = vadd.f32 %v3135_v61, %v4477_v35  ;;  %v1435_v61 = vadd.f32 %v3138_v8, %v4477_v35 }
 0x150   :  { %v3234_v39 = vpop.f32.mrb[47].mxu1  ;;  %v3146_v41 = vpop.f32.mrb[47].mxu0 }
 0x151   :  { %v4585_v44 = vadd.f32 %v3232_v30, %v1411_v42  ;;  %v3235_v60 = vadd.f32 %v3234_v39, %v3233_v31  ;;  %v3147_v45 = vadd.f32 %v3146_v41, %v3145_v38 }
 0x153   :  { %v4587_v46 = vadd.f32 %v3235_v60, %v1414_v50 }
 0x155   :  { %v3236_v12 = vpop.f32.mrb[48].mxu1  ;;  %v3300_v53 = vpop.f32.mrb[48].mxu0 }
 0x156   :  { %v3237_v43 = vpop.f32.mrb[49].mxu1  ;;  %v3301_v54 = vpop.f32.mrb[49].mxu0 }
 0x157   :  { %v3238_v58 = vadd.f32 %v3237_v43, %v3236_v12  ;;  %v3302_v14 = vadd.f32 %v3301_v54, %v3300_v53  ;;  %v3239_v1 = vpop.f32.mrb[50].mxu1  ;;  %v3303_v2 = vpop.f32.mrb[50].mxu0  ;;  %v1438_v54 = vadd.f32 %v3141_v19, %v4477_v35  ;;  %v1443_v19 = vadd.f32 %v3144_v36, %v4477_v35 }
 0x158   :  { %v3240_v3 = vpop.f32.mrb[51].mxu1  ;;  %v3304_v4 = vpop.f32.mrb[51].mxu0 }
 0x159   :  { %v4591_v22 = vadd.f32 %v3238_v58, %v1419_v5  ;;  %v4594_v6 = vadd.f32 %v3302_v14, %v4494_v57  ;;  %v3241_v7 = vadd.f32 %v3240_v3, %v3239_v1  ;;  %v3305_v11 = vadd.f32 %v3304_v4, %v3303_v2 }
 0x15b   :  { %v4596_v27 = vadd.f32 %v3241_v7, %v1422_v13  ;;  %v4599_v15 = vadd.f32 %v3305_v11, %v4498_v48 }
 0x15d   :  { %v3242_v59 = vpop.f32.mrb[52].mxu1  ;;  %v3306_v18 = vpop.f32.mrb[52].mxu0 }
 0x15e   :  { %v3243_v42 = vpop.f32.mrb[53].mxu1  ;;  %v3307_v23 = vpop.f32.mrb[53].mxu0 }
 0x15f   :  { %v3244_v26 = vadd.f32 %v3243_v42, %v3242_v59  ;;  %v3308_v29 = vadd.f32 %v3307_v23, %v3306_v18  ;;  %v3245_v50 = vpop.f32.mrb[54].mxu1  ;;  %v3309_v57 = vpop.f32.mrb[54].mxu0  ;;  %v1446_v23 = vadd.f32 %v3147_v45, %v4477_v35 }
 0x160   :  { %v3246_v30 = vpop.f32.mrb[55].mxu1  ;;  %v3310_v31 = vpop.f32.mrb[55].mxu0 }
 0x161   :  { %v4603_v38 = vadd.f32 %v3244_v26, %v1427_v37  ;;  %v4606_v39 = vadd.f32 %v3308_v29, %v4518_v20  ;;  %v3247_v48 = vadd.f32 %v3246_v30, %v3245_v50  ;;  %v3311_v41 = vadd.f32 %v3310_v31, %v3309_v57 }
 0x163   :  { %v4608_v17 = vadd.f32 %v3247_v48, %v1430_v24  ;;  %v4611_v60 = vadd.f32 %v3311_v41, %v4522_v0 }
 0x165   :  { %v3248_v5 = vpop.f32.mrb[56].mxu1  ;;  %v3312_v12 = vpop.f32.mrb[56].mxu0 }
 0x166   :  { %v3249_v53 = vpop.f32.mrb[57].mxu1  ;;  %v3313_v43 = vpop.f32.mrb[57].mxu0 }
 0x167   :  { %v3250_v13 = vadd.f32 %v3249_v53, %v3248_v5  ;;  %v3314_v58 = vadd.f32 %v3313_v43, %v3312_v12  ;;  %v3251_v14 = vpop.f32.mrb[58].mxu1  ;;  %v3315_v20 = vpop.f32.mrb[58].mxu0  ;;  %v1451_v53 = vadd.f32 %v4418_v40, %v4477_v35 }
 0x168   :  { %v3252_v1 = vpop.f32.mrb[59].mxu1  ;;  %v3316_v2 = vpop.f32.mrb[59].mxu0 }
 0x169   :  { %v4615_v3 = vadd.f32 %v3250_v13, %v1435_v61  ;;  %v4618_v4 = vadd.f32 %v3314_v58, %v4539_v49  ;;  %v3253_v0 = vadd.f32 %v3252_v1, %v3251_v14  ;;  %v3317_v7 = vadd.f32 %v3316_v2, %v3315_v20 }
 0x16b   :  { %v4620_v8 = vadd.f32 %v3253_v0, %v1438_v54  ;;  %v4623_v11 = vadd.f32 %v3317_v7, %v4543_v51 }
 0x16d   :  { %v3254_v37 = vpop.f32.mrb[60].mxu1  ;;  %v3318_v59 = vpop.f32.mrb[60].mxu0 }
 0x16e   :  { %v3255_v18 = vpop.f32.mrb[61].mxu1  ;;  %v3319_v42 = vpop.f32.mrb[61].mxu0 }
 0x16f   :  { %v3256_v24 = vadd.f32 %v3255_v18, %v3254_v37  ;;  %v3320_v26 = vadd.f32 %v3319_v42, %v3318_v59  ;;  %v3257_v29 = vpop.f32.mrb[62].mxu1  ;;  %v3321_v49 = vpop.f32.mrb[62].mxu0 }
 0x170   :  { %v3258_v50 = vpop.f32.mrb[63].mxu1  ;;  %v3322_v57 = vpop.f32.mrb[63].mxu0 }
 0x171   :  { %v4627_v30 = vadd.f32 %v3256_v24, %v1443_v19  ;;  %v4630_v31 = vadd.f32 %v3320_v26, %v4555_v10  ;;  %v3259_v51 = vadd.f32 %v3258_v50, %v3257_v29  ;;  %v3323_v48 = vadd.f32 %v3322_v57, %v3321_v49 }
 0x172   :  { %v1454_v10 = vadd.f32 %v4422_v47, %v4477_v35  ;;  %v1459_v47 = vadd.f32 %v4432_v56, %v4477_v35 }
 0x173   :  { %v4632_v36 = vadd.f32 %v3259_v51, %v1446_v23  ;;  %v4635_v41 = vadd.f32 %v3323_v48, %v4557_v28 }
 0x175   :  { %v3260_v61 = vpop.f32.mrb[64].mxu1  ;;  %v3324_v45 = vpop.f32.mrb[64].mxu0 }
 0x176   :  { %v3261_v5 = vpop.f32.mrb[65].mxu1  ;;  %v3325_v12 = vpop.f32.mrb[65].mxu0 }
 0x177   :  { %v3262_v43 = vadd.f32 %v3261_v5, %v3260_v61  ;;  %v3326_v54 = vadd.f32 %v3325_v12, %v3324_v45  ;;  %v3263_v13 = vpop.f32.mrb[66].mxu1  ;;  %v3327_v58 = vpop.f32.mrb[66].mxu0 }
 0x178   :  { %v3264_v14 = vpop.f32.mrb[67].mxu1  ;;  %v3328_v20 = vpop.f32.mrb[67].mxu0 }
 0x179   :  { %v4641_v1 = vadd.f32 %v3262_v43, %v1451_v53  ;;  %v4644_v28 = vadd.f32 %v3326_v54, %v4563_v34  ;;  %v3265_v2 = vadd.f32 %v3264_v14, %v3263_v13  ;;  %v3329_v0 = vadd.f32 %v3328_v20, %v3327_v58 }
 0x17a   :  { %v1462_v34 = vadd.f32 %v4436_v63, %v4477_v35  ;;  %v1467_v63 = vadd.f32 %v4449_v9, %v4477_v35 }
 0x17b   :  { %v4646_v7 = vadd.f32 %v3265_v2, %v1454_v10  ;;  %v4649_v40 = vadd.f32 %v3329_v0, %v4565_v52 }
 0x17d   :  { %v3266_v19 = vpop.f32.mrb[68].mxu1  ;;  %v3330_v37 = vpop.f32.mrb[68].mxu0 }
 0x17e   :  { %v3267_v59 = vpop.f32.mrb[69].mxu1  ;;  %v3331_v18 = vpop.f32.mrb[69].mxu0 }
 0x17f   :  { %v3268_v42 = vadd.f32 %v3267_v59, %v3266_v19  ;;  %v3332_v23 = vadd.f32 %v3331_v18, %v3330_v37  ;;  %v3269_v24 = vpop.f32.mrb[70].mxu1  ;;  %v3333_v26 = vpop.f32.mrb[70].mxu0 }
 0x180   :  { %v3270_v29 = vpop.f32.mrb[71].mxu1  ;;  %v3334_v49 = vpop.f32.mrb[71].mxu0 }
 0x181   :  { %v4655_v50 = vadd.f32 %v3268_v42, %v1459_v47  ;;  %v4658_v52 = vadd.f32 %v3332_v23, %v4571_v55  ;;  %v3271_v57 = vadd.f32 %v3270_v29, %v3269_v24  ;;  %v3335_v51 = vadd.f32 %v3334_v49, %v3333_v26 }
 0x182   :  { %v1470_v55 = vadd.f32 %v4453_v16, %v4477_v35  ;;  %v1475_v16 = vadd.f32 %v4463_v25, %v4477_v35 }
 0x183   :  { %v4660_v48 = vadd.f32 %v3271_v57, %v1462_v34  ;;  %v4663_v56 = vadd.f32 %v3335_v51, %v4573_v62 }
 0x185   :  { %v3272_v61 = vpop.f32.mrb[72].mxu1  ;;  %v3336_v45 = vpop.f32.mrb[72].mxu0 }
 0x186   :  { %v3273_v5 = vpop.f32.mrb[73].mxu1  ;;  %v3337_v12 = vpop.f32.mrb[73].mxu0 }
 0x187   :  { %v3274_v53 = vadd.f32 %v3273_v5, %v3272_v61  ;;  %v3338_v43 = vadd.f32 %v3337_v12, %v3336_v45  ;;  %v3275_v54 = vpop.f32.mrb[74].mxu1  ;;  %v3339_v13 = vpop.f32.mrb[74].mxu0 }
 0x188   :  { %v3276_v58 = vpop.f32.mrb[75].mxu1  ;;  %v3340_v10 = vpop.f32.mrb[75].mxu0 }
 0x189   :  { %v4669_v14 = vadd.f32 %v3274_v53, %v1467_v63  ;;  %v4672_v62 = vadd.f32 %v3338_v43, %v4579_v33  ;;  %v3277_v20 = vadd.f32 %v3276_v58, %v3275_v54  ;;  %v3341_v2 = vadd.f32 %v3340_v10, %v3339_v13 }
 0x18a   :  { %v1478_v33 = vadd.f32 %v4467_v32, %v4477_v35 }
 0x18b   :  { %v4674_v0 = vadd.f32 %v3277_v20, %v1470_v55  ;;  %v4677_v9 = vadd.f32 %v3341_v2, %v4581_v21  ;;  %v3813_v2 = vld [vmem:[%s5032_s5 + $0x8] sm:$0xff]  }
 0x18d   :  { %v3278_v19 = vpop.f32.mrb[76].mxu1  ;;  %v3342_v37 = vpop.f32.mrb[76].mxu0 }
 0x18e   :  { %v3279_v59 = vpop.f32.mrb[77].mxu1  ;;  %v3343_v18 = vpop.f32.mrb[77].mxu0 }
 0x18f   :  { %v3280_v47 = vadd.f32 %v3279_v59, %v3278_v19  ;;  %v3344_v42 = vadd.f32 %v3343_v18, %v3342_v37  ;;  %v3281_v23 = vpop.f32.mrb[78].mxu1  ;;  %v3345_v24 = vpop.f32.mrb[78].mxu0 }
 0x190   :  { %v3282_v26 = vpop.f32.mrb[79].mxu1  ;;  %v3346_v34 = vpop.f32.mrb[79].mxu0 }
 0x191   :  { %v4683_v29 = vadd.f32 %v3280_v47, %v1475_v16  ;;  %v4686_v21 = vadd.f32 %v3344_v42, %v4585_v44  ;;  %v3283_v49 = vadd.f32 %v3282_v26, %v3281_v23  ;;  %v3347_v57 = vadd.f32 %v3346_v34, %v3345_v24 }
 0x193   :  { %v4688_v51 = vadd.f32 %v3283_v49, %v1478_v33  ;;  %v4691_v25 = vadd.f32 %v3347_v57, %v4587_v46  ;;  %v3812_v46 = vld [vmem:[%s5032_s5] sm:$0xff]  }
 0x194   :  { %3628 = vmatprep.subr.bf16.mxu1 %v3812_v46 }
 0x195   :  { %v3348_v61 = vpop.f32.mrb[80].mxu0  ;;  %v3412_v45 = vpop.f32.mrb[80].mxu1  ;;  %3629 = vmatpush3.bf16.msra.mxu1 %v3812_v46 }
 0x196   :  { %v3349_v5 = vpop.f32.mrb[81].mxu0  ;;  %v3413_v12 = vpop.f32.mrb[81].mxu1  ;;  %3630 = vmatprep.subr.bf16.mxu1 %v3813_v2 }
 0x197   :  { %v3350_v63 = vadd.f32 %v3349_v5, %v3348_v61  ;;  %v3414_v32 = vadd.f32 %v3413_v12, %v3412_v45  ;;  %v3351_v35 = vpop.f32.mrb[82].mxu0  ;;  %v3415_v53 = vpop.f32.mrb[82].mxu1  ;;  %v3815_v5 = vld [vmem:[%s5032_s5 + $0x18] sm:$0xff]  }
 0x198   :  { %v3352_v43 = vpop.f32.mrb[83].mxu0  ;;  %v3416_v54 = vpop.f32.mrb[83].mxu1 }
 0x199   :  { %v4694_v44 = vadd.f32 %v3350_v63, %v4591_v22  ;;  %v1838_v13 = vadd.f32 %v3414_v32, %v4594_v6  ;;  %v3353_v55 = vadd.f32 %v3352_v43, %v3351_v35  ;;  %v3417_v58 = vadd.f32 %v3416_v54, %v3415_v53  ;;  %3631 = vmatpush3.bf16.msra.mxu1 %v3813_v2 }
 0x19b   :  { %v4701_v10 = vadd.f32 %v3353_v55, %v4596_v27  ;;  %v1841_v20 = vadd.f32 %v3417_v58, %v4599_v15  ;;  %v1964_v22 = vmax.f32 %v1838_v13, 0.0  ;;  %v3814_v15 = vld [vmem:[%s5032_s5 + $0x10] sm:$0xff]  }
 0x19c   :  { %3632 = vmatprep.subr.bf16.mxu1 %v3814_v15 }
 0x19d   :  { %v1965_v19 = vmax.f32 %v1841_v20, 0.0  ;;  %v3354_v37 = vpop.f32.mrb[84].mxu0  ;;  %v3418_v6 = vpop.f32.mrb[84].mxu1  ;;  %3633 = vmatpush3.bf16.msra.mxu1 %v3814_v15 }
 0x19e   :  { %v3355_v59 = vpop.f32.mrb[85].mxu0  ;;  %v3419_v18 = vpop.f32.mrb[85].mxu1  ;;  %3634 = vmatprep.subr.bf16.mxu1 %v3815_v5 }
 0x19f   :  { %v3356_v16 = vadd.f32 %v3355_v59, %v3354_v37  ;;  %v3420_v47 = vadd.f32 %v3419_v18, %v3418_v6  ;;  %v3357_v42 = vpop.f32.mrb[86].mxu0  ;;  %v3421_v27 = vpop.f32.mrb[86].mxu1  ;;  %v1996_v23 = vpack.c.bf16 %v1965_v19, %v1964_v22  ;;  %v3817_v6 = vld [vmem:[%s5032_s5 + $0x28] sm:$0xff]  }
 0x1a0   :  { %v3358_v24 = vpop.f32.mrb[87].mxu0  ;;  %v3422_v33 = vpop.f32.mrb[87].mxu1 }
 0x1a1   :  { %v4711_v26 = vadd.f32 %v3356_v16, %v4603_v38  ;;  %v1846_v34 = vadd.f32 %v3420_v47, %v4606_v39  ;;  %v3359_v49 = vadd.f32 %v3358_v24, %v3357_v42  ;;  %v3423_v57 = vadd.f32 %v3422_v33, %v3421_v27  ;;  %3596 = vmatprep.mubr.bf16.mxu0 %v1996_v23 }
 0x1a2   :  { %3635 = vmatpush3.bf16.msra.mxu1 %v3815_v5 }
 0x1a3   :  { %v4715_v61 = vadd.f32 %v3359_v49, %v4608_v17  ;;  %v1849_v45 = vadd.f32 %v3423_v57, %v4611_v60  ;;  %v1966_v12 = vmax.f32 %v1846_v34, 0.0  ;;  %v3816_v60 = vld [vmem:[%s5032_s5 + $0x20] sm:$0xff]  }
 0x1a4   :  { %3636 = vmatprep.subr.bf16.mxu1 %v3816_v60 }
 0x1a5   :  { %v1967_v63 = vmax.f32 %v1849_v45, 0.0  ;;  %v3360_v38 = vpop.f32.mrb[88].mxu0  ;;  %v3424_v32 = vpop.f32.mrb[88].mxu1 }
 0x1a6   :  { %v3361_v35 = vpop.f32.mrb[89].mxu0  ;;  %v3425_v39 = vpop.f32.mrb[89].mxu1  ;;  %3637 = vmatpush3.bf16.msra.mxu1 %v3816_v60 }
 0x1a7   :  { %v1997_v53 = vpack.c.bf16 %v1967_v63, %v1966_v12  ;;  %v3362_v43 = vadd.f32 %v3361_v35, %v3360_v38  ;;  %v3426_v54 = vadd.f32 %v3425_v39, %v3424_v32  ;;  %v3363_v13 = vpop.f32.mrb[90].mxu0  ;;  %v3427_v17 = vpop.f32.mrb[90].mxu1  ;;  %3638 = vmatprep.subr.bf16.mxu1 %v3817_v6 }
 0x1a8   :  { %v3364_v55 = vpop.f32.mrb[91].mxu0  ;;  %v3428_v58 = vpop.f32.mrb[91].mxu1 }
 0x1a9   :  { %v4725_v46 = vadd.f32 %v3362_v43, %v4615_v3  ;;  %v1854_v20 = vadd.f32 %v3426_v54, %v4618_v4  ;;  %v3365_v2 = vadd.f32 %v3364_v55, %v3363_v13  ;;  %v3429_v22 = vadd.f32 %v3428_v58, %v3427_v17  ;;  %3597 = vmatmul.mubr.bf16.vlgmr.msra.gmra.mrb[112].mxu0 %v1997_v53 }
 0x1aa   :  { %3639 = vmatpush3.bf16.msra.mxu1 %v3817_v6 }
 0x1ab   :  { %v4729_v19 = vadd.f32 %v3365_v2, %v4620_v8  ;;  %v1857_v37 = vadd.f32 %v3429_v22, %v4623_v11  ;;  %v1968_v59 = vmax.f32 %v1854_v20, 0.0 }
 0x1ad   :  { %v1969_v18 = vmax.f32 %v1857_v37, 0.0  ;;  %v3366_v3 = vpop.f32.mrb[92].mxu0  ;;  %v3430_v16 = vpop.f32.mrb[92].mxu1 }
 0x1ae   :  { %v3367_v47 = vpop.f32.mrb[93].mxu0  ;;  %v3431_v4 = vpop.f32.mrb[93].mxu1 }
 0x1af   :  { %v3368_v42 = vadd.f32 %v3367_v47, %v3366_v3  ;;  %v3432_v27 = vadd.f32 %v3431_v4, %v3430_v16  ;;  %v3369_v23 = vpop.f32.mrb[94].mxu0  ;;  %v3433_v15 = vpop.f32.mrb[94].mxu1  ;;  %v1998_v8 = vpack.c.bf16 %v1969_v18, %v1968_v59 }
 0x1b0   :  { %v3370_v24 = vpop.f32.mrb[95].mxu0  ;;  %v3434_v11 = vpop.f32.mrb[95].mxu1 }
 0x1b1   :  { %v4736_v33 = vadd.f32 %v3368_v42, %v4627_v30  ;;  %v1862_v34 = vadd.f32 %v3432_v27, %v4630_v31  ;;  %v3371_v49 = vadd.f32 %v3370_v24, %v3369_v23  ;;  %v3435_v57 = vadd.f32 %v3434_v11, %v3433_v15  ;;  %3600 = vmatprep.mubr.bf16.mxu0 %v1998_v8 }
 0x1b3   :  { %v4740_v45 = vadd.f32 %v3371_v49, %v4632_v36  ;;  %v1865_v5 = vadd.f32 %v3435_v57, %v4635_v41  ;;  %v1970_v12 = vmax.f32 %v1862_v34, 0.0 }
 0x1b5   :  { %v1971_v63 = vmax.f32 %v1865_v5, 0.0  ;;  %v3372_v38 = vpop.f32.mrb[96].mxu0  ;;  %v3436_v32 = vpop.f32.mrb[96].mxu1 }
 0x1b6   :  { %v3373_v35 = vpop.f32.mrb[97].mxu0  ;;  %v3437_v39 = vpop.f32.mrb[97].mxu1 }
 0x1b7   :  { %v3374_v53 = vadd.f32 %v3373_v35, %v3372_v38  ;;  %v3438_v30 = vadd.f32 %v3437_v39, %v3436_v32  ;;  %v3375_v43 = vpop.f32.mrb[98].mxu0  ;;  %v3439_v54 = vpop.f32.mrb[98].mxu1  ;;  %v1999_v31 = vpack.c.bf16 %v1971_v63, %v1970_v12 }
 0x1b8   :  { %v3376_v13 = vpop.f32.mrb[99].mxu0  ;;  %v3440_v17 = vpop.f32.mrb[99].mxu1 }
 0x1b9   :  { %v4744_v60 = vadd.f32 %v3374_v53, %v4641_v1  ;;  %v1870_v36 = vadd.f32 %v3438_v30, %v4644_v28  ;;  %v3377_v55 = vadd.f32 %v3376_v13, %v3375_v43  ;;  %v3441_v41 = vadd.f32 %v3440_v17, %v3439_v54  ;;  %3601 = vmatmul.mubr.bf16.gmra.mrb[116].mxu0 %v1999_v31 }
 0x1bb   :  { %v4748_v58 = vadd.f32 %v3377_v55, %v4646_v7  ;;  %v1873_v20 = vadd.f32 %v3441_v41, %v4649_v40  ;;  %v1972_v2 = vmax.f32 %v1870_v36, 0.0 }
 0x1bd   :  { %v1973_v22 = vmax.f32 %v1873_v20, 0.0  ;;  %v3378_v37 = vpop.f32.mrb[100].mxu0  ;;  %v3442_v6 = vpop.f32.mrb[100].mxu1 }
 0x1be   :  { %v3379_v59 = vpop.f32.mrb[101].mxu0  ;;  %v3443_v18 = vpop.f32.mrb[101].mxu1 }
 0x1bf   :  { %v3380_v3 = vadd.f32 %v3379_v59, %v3378_v37  ;;  %v3444_v16 = vadd.f32 %v3443_v18, %v3442_v6  ;;  %v3381_v1 = vpop.f32.mrb[102].mxu0  ;;  %v3445_v47 = vpop.f32.mrb[102].mxu1  ;;  %v2000_v4 = vpack.c.bf16 %v1973_v22, %v1972_v2 }
 0x1c0   :  { %v3382_v28 = vpop.f32.mrb[103].mxu0  ;;  %v3446_v42 = vpop.f32.mrb[103].mxu1 }
 0x1c1   :  { %v4752_v27 = vadd.f32 %v3380_v3, %v4655_v50  ;;  %v1878_v7 = vadd.f32 %v3444_v16, %v4658_v52  ;;  %v3383_v23 = vadd.f32 %v3382_v28, %v3381_v1  ;;  %v3447_v40 = vadd.f32 %v3446_v42, %v3445_v47  ;;  %3604 = vmatprep.mubr.bf16.mxu0 %v2000_v4 }
 0x1c3   :  { %v4756_v15 = vadd.f32 %v3383_v23, %v4660_v48  ;;  %v1881_v8 = vadd.f32 %v3447_v40, %v4663_v56  ;;  %v1974_v24 = vmax.f32 %v1878_v7, 0.0 }
 0x1c5   :  { %v1975_v11 = vmax.f32 %v1881_v8, 0.0  ;;  %v3384_v34 = vpop.f32.mrb[104].mxu0  ;;  %v3448_v49 = vpop.f32.mrb[104].mxu1 }
 0x1c6   :  { %v3385_v57 = vpop.f32.mrb[105].mxu0  ;;  %v3449_v5 = vpop.f32.mrb[105].mxu1 }
 0x1c7   :  { %v3386_v12 = vadd.f32 %v3385_v57, %v3384_v34  ;;  %v3450_v63 = vadd.f32 %v3449_v5, %v3448_v49  ;;  %v3387_v50 = vpop.f32.mrb[106].mxu0  ;;  %v3451_v38 = vpop.f32.mrb[106].mxu1  ;;  %v2001_v32 = vpack.c.bf16 %v1975_v11, %v1974_v24 }
 0x1c8   :  { %v3388_v52 = vpop.f32.mrb[107].mxu0  ;;  %v3452_v35 = vpop.f32.mrb[107].mxu1 }
 0x1c9   :  { %v4760_v39 = vadd.f32 %v3386_v12, %v4669_v14  ;;  %v1886_v48 = vadd.f32 %v3450_v63, %v4672_v62  ;;  %v3389_v53 = vadd.f32 %v3388_v52, %v3387_v50  ;;  %v3453_v56 = vadd.f32 %v3452_v35, %v3451_v38  ;;  %3605 = vmatmul.mubr.bf16.gmra.mrb[120].mxu0 %v2001_v32 }
 0x1cb   :  { %v4764_v30 = vadd.f32 %v3389_v53, %v4674_v0  ;;  %v1889_v43 = vadd.f32 %v3453_v56, %v4677_v9  ;;  %v1976_v54 = vmax.f32 %v1886_v48, 0.0 }
 0x1cd   :  { %v1977_v31 = vmax.f32 %v1889_v43, 0.0  ;;  %v3390_v13 = vpop.f32.mrb[108].mxu0  ;;  %v3454_v17 = vpop.f32.mrb[108].mxu1 }
 0x1ce   :  { %v3391_v36 = vpop.f32.mrb[109].mxu0  ;;  %v3455_v55 = vpop.f32.mrb[109].mxu1 }
 0x1cf   :  { %v3392_v41 = vadd.f32 %v3391_v36, %v3390_v13  ;;  %v3456_v20 = vadd.f32 %v3455_v55, %v3454_v17  ;;  %v3393_v14 = vpop.f32.mrb[110].mxu0  ;;  %v3457_v2 = vpop.f32.mrb[110].mxu1  ;;  %v2002_v22 = vpack.c.bf16 %v1977_v31, %v1976_v54 }
 0x1d0   :  { %v3394_v62 = vpop.f32.mrb[111].mxu0  ;;  %v3458_v37 = vpop.f32.mrb[111].mxu1 }
 0x1d1   :  { %v4768_v6 = vadd.f32 %v3392_v41, %v4683_v29  ;;  %v1894_v0 = vadd.f32 %v3456_v20, %v4686_v21  ;;  %v3395_v59 = vadd.f32 %v3394_v62, %v3393_v14  ;;  %v3459_v9 = vadd.f32 %v3458_v37, %v3457_v2  ;;  %3608 = vmatprep.mubr.bf16.mxu0 %v2002_v22 }
 0x1d3   :  { %v4772_v18 = vadd.f32 %v3395_v59, %v4688_v51  ;;  %v1897_v3 = vadd.f32 %v3459_v9, %v4691_v25  ;;  %v1978_v16 = vmax.f32 %v1894_v0, 0.0 }
 0x1d5   :  { %v1979_v1 = vmax.f32 %v1897_v3, 0.0  ;;  %v3460_v47 = vpop.f32.mrb[112].mxu1 }
 0x1d6   :  { %v3461_v4 = vpop.f32.mrb[113].mxu1 }
 0x1d7   :  { %v3462_v28 = vadd.f32 %v3461_v4, %v3460_v47  ;;  %v3463_v42 = vpop.f32.mrb[114].mxu1  ;;  %v2003_v7 = vpack.c.bf16 %v1979_v1, %v1978_v16 }
 0x1d8   :  { %v3464_v23 = vpop.f32.mrb[115].mxu1 }
 0x1d9   :  { %v1902_v29 = vadd.f32 %v3462_v28, %v4694_v44  ;;  %v3465_v40 = vadd.f32 %v3464_v23, %v3463_v42  ;;  %3609 = vmatmul.mubr.bf16.gmra.mrb[124].mxu0 %v2003_v7 }
 0x1db   :  { %v1905_v21 = vadd.f32 %v3465_v40, %v4701_v10  ;;  %v1980_v8 = vmax.f32 %v1902_v29, 0.0 }
 0x1dd   :  { %v1981_v24 = vmax.f32 %v1905_v21, 0.0  ;;  %v3466_v51 = vpop.f32.mrb[116].mxu1 }
 0x1de   :  { %v3467_v11 = vpop.f32.mrb[117].mxu1 }
 0x1df   :  { %v3468_v34 = vadd.f32 %v3467_v11, %v3466_v51  ;;  %v3469_v25 = vpop.f32.mrb[118].mxu1  ;;  %v2004_v49 = vpack.c.bf16 %v1981_v24, %v1980_v8 }
 0x1e0   :  { %v3470_v57 = vpop.f32.mrb[119].mxu1 }
 0x1e1   :  { %v1910_v5 = vadd.f32 %v3468_v34, %v4711_v26  ;;  %v3471_v12 = vadd.f32 %v3470_v57, %v3469_v25  ;;  %3612 = vmatprep.mubr.bf16.mxu0 %v2004_v49 }
 0x1e3   :  { %v1913_v63 = vadd.f32 %v3471_v12, %v4715_v61  ;;  %v1982_v50 = vmax.f32 %v1910_v5, 0.0 }
 0x1e5   :  { %v1983_v44 = vmax.f32 %v1913_v63, 0.0  ;;  %v3472_v38 = vpop.f32.mrb[120].mxu1 }
 0x1e6   :  { %v3473_v32 = vpop.f32.mrb[121].mxu1 }
 0x1e7   :  { %v3474_v52 = vadd.f32 %v3473_v32, %v3472_v38  ;;  %v3475_v10 = vpop.f32.mrb[122].mxu1  ;;  %v2005_v35 = vpack.c.bf16 %v1983_v44, %v1982_v50 }
 0x1e8   :  { %v3476_v48 = vpop.f32.mrb[123].mxu1 }
 0x1e9   :  { %v1918_v53 = vadd.f32 %v3474_v52, %v4725_v46  ;;  %v3477_v56 = vadd.f32 %v3476_v48, %v3475_v10  ;;  %3613 = vmatmul.mubr.bf16.gmra.mrb[128].mxu0 %v2005_v35 }
 0x1eb   :  { %v1921_v43 = vadd.f32 %v3477_v56, %v4729_v19  ;;  %v1984_v54 = vmax.f32 %v1918_v53, 0.0 }
 0x1ed   :  { %v1985_v26 = vmax.f32 %v1921_v43, 0.0  ;;  %v3478_v31 = vpop.f32.mrb[124].mxu1  ;;  %v3821_v43 = vld [vmem:[%s5034_s7 + $0x8] sm:$0xff]  }
 0x1ee   :  { %v3479_v13 = vpop.f32.mrb[125].mxu1 }
 0x1ef   :  { %v3480_v17 = vadd.f32 %v3479_v13, %v3478_v31  ;;  %v3481_v61 = vpop.f32.mrb[126].mxu1  ;;  %v2006_v36 = vpack.c.bf16 %v1985_v26, %v1984_v54  ;;  %v3822_v54 = vld [vmem:[%s5034_s7 + $0x10] sm:$0xff]  }
 0x1f0   :  { %v3482_v55 = vpop.f32.mrb[127].mxu1 }
 0x1f1   :  { %v1926_v41 = vadd.f32 %v3480_v17, %v4736_v33  ;;  %v3483_v20 = vadd.f32 %v3482_v55, %v3481_v61  ;;  %3616 = vmatprep.mubr.bf16.mxu0 %v2006_v36 }
 0x1f3   :  { %v1929_v14 = vadd.f32 %v3483_v20, %v4740_v45  ;;  %v1986_v2 = vmax.f32 %v1926_v41, 0.0  ;;  %v3818_v45 = vld [vmem:[%s5032_s5 + $0x30] sm:$0xff]   ;;  %v3823_v41 = vld [vmem:[%s5034_s7 + $0x18] sm:$0xff]  }
 0x1f4   :  { %3640 = vmatprep.subr.bf16.mxu1 %v3818_v45 }
 0x1f5   :  { %v1987_v46 = vmax.f32 %v1929_v14, 0.0  ;;  %v3484_v22 = vpop.f32.mrb[128].mxu1  ;;  %3641 = vmatpush3.bf16.msra.mxu1 %v3818_v45 }
 0x1f6   :  { %v3485_v62 = vpop.f32.mrb[129].mxu1 }
 0x1f7   :  { %v3486_v37 = vadd.f32 %v3485_v62, %v3484_v22  ;;  %v3487_v19 = vpop.f32.mrb[130].mxu1  ;;  %v2007_v0 = vpack.c.bf16 %v1987_v46, %v1986_v2 }
 0x1f8   :  { %v3488_v59 = vpop.f32.mrb[131].mxu1 }
 0x1f9   :  { %v1934_v9 = vadd.f32 %v3486_v37, %v4744_v60  ;;  %v3489_v3 = vadd.f32 %v3488_v59, %v3487_v19  ;;  %3617 = vmatmul.mubr.bf16.gmra.mrb[132].mxu0 %v2007_v0  ;;  %v3824_v37 = vld [vmem:[%s5034_s7 + $0x20] sm:$0xff]   ;;  %v3825_v19 = vld [vmem:[%s5034_s7 + $0x28] sm:$0xff]  }
 0x1fb   :  { %v1937_v16 = vadd.f32 %v3489_v3, %v4748_v58  ;;  %v1988_v1 = vmax.f32 %v1934_v9, 0.0  ;;  %v3819_v58 = vld [vmem:[%s5032_s5 + $0x38] sm:$0xff]  }
 0x1fc   :  { %3642 = vmatprep.subr.bf16.mxu1 %v3819_v58 }
 0x1fd   :  { %v1989_v33 = vmax.f32 %v1937_v16, 0.0  ;;  %v3490_v47 = vpop.f32.mrb[132].mxu1  ;;  %3643 = vmatpush3.bf16.msra.mxu1 %v3819_v58 }
 0x1fe   :  { %v3491_v4 = vpop.f32.mrb[133].mxu1 }
 0x1ff   :  { %v3492_v28 = vadd.f32 %v3491_v4, %v3490_v47  ;;  %v3493_v42 = vpop.f32.mrb[134].mxu1  ;;  %v2008_v7 = vpack.c.bf16 %v1989_v33, %v1988_v1 }
 0x200   :  { %v3494_v23 = vpop.f32.mrb[135].mxu1 }
 0x201   :  { %v1942_v60 = vadd.f32 %v3492_v28, %v4752_v27  ;;  %v3495_v29 = vadd.f32 %v3494_v23, %v3493_v42  ;;  %3620 = vmatprep.mubr.bf16.mxu0 %v2008_v7 }
 0x203   :  { %v1945_v40 = vadd.f32 %v3495_v29, %v4756_v15  ;;  %v1990_v21 = vmax.f32 %v1942_v60, 0.0 }
 0x205   :  { %v1991_v8 = vmax.f32 %v1945_v40, 0.0  ;;  %v3496_v24 = vpop.f32.mrb[136].mxu1 }
 0x206   :  { %v3497_v51 = vpop.f32.mrb[137].mxu1 }
 0x207   :  { %v3498_v11 = vadd.f32 %v3497_v51, %v3496_v24  ;;  %v3499_v34 = vpop.f32.mrb[138].mxu1  ;;  %v2009_v25 = vpack.c.bf16 %v1991_v8, %v1990_v21 }
 0x208   :  { %v3500_v49 = vpop.f32.mrb[139].mxu1 }
 0x209   :  { %v1950_v27 = vadd.f32 %v3498_v11, %v4760_v39  ;;  %v3501_v57 = vadd.f32 %v3500_v49, %v3499_v34  ;;  %3621 = vmatmul.mubr.bf16.gmra.mrb[136].mxu0 %v2009_v25 }
 0x20b   :  { %v1953_v5 = vadd.f32 %v3501_v57, %v4764_v30  ;;  %v1992_v12 = vmax.f32 %v1950_v27, 0.0  ;;  %v3820_v30 = vld [vmem:[%s5034_s7] sm:$0xff]  }
 0x20c   :  { %3676 = vmatprep.subr.bf16.mxu0 %v3820_v30 }
 0x20d   :  { %v1993_v63 = vmax.f32 %v1953_v5, 0.0  ;;  %v3502_v50 = vpop.f32.mrb[140].mxu1  ;;  %3677 = vmatpush3.bf16.msra.mxu0 %v3820_v30 }
 0x20e   :  { %v3503_v15 = vpop.f32.mrb[141].mxu1  ;;  %3678 = vmatprep.subr.bf16.mxu0 %v3821_v43 }
 0x20f   :  { %v3504_v44 = vadd.f32 %v3503_v15, %v3502_v50  ;;  %v3505_v38 = vpop.f32.mrb[142].mxu1  ;;  %v2010_v32 = vpack.c.bf16 %v1993_v63, %v1992_v12 }
 0x210   :  { %v3506_v52 = vpop.f32.mrb[143].mxu1 }
 0x211   :  { %v1958_v10 = vadd.f32 %v3504_v44, %v4768_v6  ;;  %v3507_v35 = vadd.f32 %v3506_v52, %v3505_v38  ;;  %3624 = vmatprep.mubr.bf16.mxu0 %v2010_v32  ;;  %v4806_v6 = vld [vmem:[%s5033_s4] ss:$0 sm:$0xff]  ;;  %3679 = vmatpush3.bf16.msra.mxu0 %v3821_v43 }
 0x212   :  { %3680 = vmatprep.subr.bf16.mxu0 %v3822_v54 }
 0x213   :  { %v1961_v48 = vadd.f32 %v3507_v35, %v4772_v18  ;;  %v1994_v53 = vmax.f32 %v1958_v10, 0.0 }
 0x215   :  { %v1995_v39 = vmax.f32 %v1961_v48, 0.0  ;;  %3681 = vmatpush3.bf16.msra.mxu0 %v3822_v54 }
 0x216   :  { %3682 = vmatprep.subr.bf16.mxu0 %v3823_v41 }
 0x217   :  { %v2011_v56 = vpack.c.bf16 %v1995_v39, %v1994_v53 }
 0x219   :  { %3625 = vmatmul.mubr.bf16.gmra.mrb[140].mxu0 %v2011_v56 }
 0x21a   :  { %3683 = vmatpush3.bf16.msra.mxu0 %v3823_v41 }
 0x21b   :  { %3684 = vmatprep.subr.bf16.mxu0 %v3824_v37 }
 0x21e   :  { %3685 = vmatpush3.bf16.msra.mxu0 %v3824_v37 }
 0x21f   :  { %3686 = vmatprep.subr.bf16.mxu0 %v3825_v19 }
 0x222   :  { %3687 = vmatpush3.bf16.msra.mxu0 %v3825_v19 }
 0x27c   :  { %v3598_v18 = vpop.f32.mrb[112].mxu0 }
 0x27d   :  { %v2126_v26 = vadd.f32 %v3598_v18, %v4806_v6  ;;  %v2117_v31 = vpop.f32.mrb[113].mxu0 }
 0x27e   :  { %v2118_v13 = vadd.f32 %v4806_v6, %v2117_v31  ;;  %v3599_v17 = vpop.f32.mrb[114].mxu0 }
 0x27f   :  { %v2129_v61 = vadd.f32 %v3599_v17, %v4806_v6  ;;  %v2120_v36 = vpop.f32.mrb[115].mxu0  ;;  %v2246_v20 = vmax.f32 %v2126_v26, 0.0 }
 0x280   :  { %v2121_v55 = vadd.f32 %v4806_v6, %v2120_v36  ;;  %v2244_v2 = vmax.f32 %v2118_v13, 0.0 }
 0x281   :  { %v2247_v14 = vmax.f32 %v2129_v61, 0.0 }
 0x282   :  { %v2245_v46 = vmax.f32 %v2121_v55, 0.0 }
 0x283   :  { %v2277_v22 = vpack.c.bf16 %v2247_v14, %v2246_v20 }
 0x284   :  { %v2276_v62 = vpack.c.bf16 %v2245_v46, %v2244_v2 }
 0x286   :  { %3644 = vmatprep.mubr.bf16.mxu1 %v2276_v62 }
 0x287   :  { %3645 = vmatmul.mubr.bf16.vlgmr.msra.gmra.mrb[144].mxu1 %v2277_v22 }
 0x28c   :  { %v3602_v0 = vpop.f32.mrb[116].mxu0 }
 0x28d   :  { %v2142_v59 = vadd.f32 %v3602_v0, %v4806_v6  ;;  %v2133_v9 = vpop.f32.mrb[117].mxu0 }
 0x28e   :  { %v2134_v3 = vadd.f32 %v4806_v6, %v2133_v9  ;;  %v3603_v16 = vpop.f32.mrb[118].mxu0 }
 0x28f   :  { %v2145_v1 = vadd.f32 %v3603_v16, %v4806_v6  ;;  %v2136_v33 = vpop.f32.mrb[119].mxu0  ;;  %v2250_v45 = vmax.f32 %v2142_v59, 0.0 }
 0x290   :  { %v2137_v47 = vadd.f32 %v4806_v6, %v2136_v33  ;;  %v2248_v28 = vmax.f32 %v2134_v3, 0.0 }
 0x291   :  { %v2251_v4 = vmax.f32 %v2145_v1, 0.0 }
 0x292   :  { %v2249_v42 = vmax.f32 %v2137_v47, 0.0  ;;  %v3826_v47 = vld [vmem:[%s5034_s7 + $0x30] sm:$0xff]  }
 0x293   :  { %v2279_v7 = vpack.c.bf16 %v2251_v4, %v2250_v45  ;;  %3688 = vmatprep.subr.bf16.mxu0 %v3826_v47 }
 0x294   :  { %v2278_v23 = vpack.c.bf16 %v2249_v42, %v2248_v28  ;;  %3689 = vmatpush3.bf16.msra.mxu0 %v3826_v47 }
 0x296   :  { %3648 = vmatprep.mubr.bf16.mxu1 %v2278_v23 }
 0x297   :  { %3649 = vmatmul.mubr.bf16.gmra.mrb[148].mxu1 %v2279_v7 }
 0x29c   :  { %v3606_v60 = vpop.f32.mrb[120].mxu0 }
 0x29d   :  { %v2158_v29 = vadd.f32 %v3606_v60, %v4806_v6  ;;  %v2149_v58 = vpop.f32.mrb[121].mxu0 }
 0x29e   :  { %v2150_v40 = vadd.f32 %v4806_v6, %v2149_v58  ;;  %v3607_v21 = vpop.f32.mrb[122].mxu0 }
 0x29f   :  { %v2161_v8 = vadd.f32 %v3607_v21, %v4806_v6  ;;  %v2152_v24 = vpop.f32.mrb[123].mxu0  ;;  %v2254_v11 = vmax.f32 %v2158_v29, 0.0  ;;  %v3827_v29 = vld [vmem:[%s5034_s7 + $0x38] sm:$0xff]  }
 0x2a0   :  { %v2153_v51 = vadd.f32 %v4806_v6, %v2152_v24  ;;  %v2252_v25 = vmax.f32 %v2150_v40, 0.0  ;;  %3690 = vmatprep.subr.bf16.mxu0 %v3827_v29 }
 0x2a1   :  { %v2255_v34 = vmax.f32 %v2161_v8, 0.0  ;;  %3691 = vmatpush3.bf16.msra.mxu0 %v3827_v29 }
 0x2a2   :  { %v2253_v49 = vmax.f32 %v2153_v51, 0.0 }
 0x2a3   :  { %v2281_v27 = vpack.c.bf16 %v2255_v34, %v2254_v11 }
 0x2a4   :  { %v2280_v57 = vpack.c.bf16 %v2253_v49, %v2252_v25 }
 0x2a6   :  { %3652 = vmatprep.mubr.bf16.mxu1 %v2280_v57 }
 0x2a7   :  { %3653 = vmatmul.mubr.bf16.gmra.mrb[152].mxu1 %v2281_v27 }
 0x2ac   :  { %v3610_v5 = vpop.f32.mrb[124].mxu0 }
 0x2ad   :  { %v2174_v12 = vadd.f32 %v3610_v5, %v4806_v6  ;;  %v2165_v63 = vpop.f32.mrb[125].mxu0 }
 0x2ae   :  { %v2166_v50 = vadd.f32 %v4806_v6, %v2165_v63  ;;  %v3611_v15 = vpop.f32.mrb[126].mxu0 }
 0x2af   :  { %v2177_v44 = vadd.f32 %v3611_v15, %v4806_v6  ;;  %v2168_v38 = vpop.f32.mrb[127].mxu0  ;;  %v2258_v52 = vmax.f32 %v2174_v12, 0.0 }
 0x2b0   :  { %v2169_v32 = vadd.f32 %v4806_v6, %v2168_v38  ;;  %v2256_v35 = vmax.f32 %v2166_v50, 0.0 }
 0x2b1   :  { %v2259_v10 = vmax.f32 %v2177_v44, 0.0 }
 0x2b2   :  { %v2257_v48 = vmax.f32 %v2169_v32, 0.0 }
 0x2b3   :  { %v2283_v53 = vpack.c.bf16 %v2259_v10, %v2258_v52  ;;  %v4861_v10 = vld [vmem:[%s5035_s6] ss:$0 sm:$0xff] }
 0x2b4   :  { %v2282_v39 = vpack.c.bf16 %v2257_v48, %v2256_v35 }
 0x2b6   :  { %3656 = vmatprep.mubr.bf16.mxu1 %v2282_v39 }
 0x2b7   :  { %3657 = vmatmul.mubr.bf16.gmra.mrb[156].mxu1 %v2283_v53 }
 0x2bc   :  { %v3614_v56 = vpop.f32.mrb[128].mxu0 }
 0x2bd   :  { %v2190_v30 = vadd.f32 %v3614_v56, %v4806_v6  ;;  %v2181_v43 = vpop.f32.mrb[129].mxu0 }
 0x2be   :  { %v2182_v18 = vadd.f32 %v4806_v6, %v2181_v43  ;;  %v3615_v54 = vpop.f32.mrb[130].mxu0 }
 0x2bf   :  { %v2193_v26 = vadd.f32 %v3615_v54, %v4806_v6  ;;  %v2184_v31 = vpop.f32.mrb[131].mxu0  ;;  %v2262_v17 = vmax.f32 %v2190_v30, 0.0 }
 0x2c0   :  { %v2185_v13 = vadd.f32 %v4806_v6, %v2184_v31  ;;  %v2260_v36 = vmax.f32 %v2182_v18, 0.0 }
 0x2c1   :  { %v2263_v61 = vmax.f32 %v2193_v26, 0.0 }
 0x2c2   :  { %v2261_v55 = vmax.f32 %v2185_v13, 0.0 }
 0x2c3   :  { %v2285_v41 = vpack.c.bf16 %v2263_v61, %v2262_v17 }
 0x2c4   :  { %v2284_v20 = vpack.c.bf16 %v2261_v55, %v2260_v36 }
 0x2c6   :  { %3660 = vmatprep.mubr.bf16.mxu1 %v2284_v20 }
 0x2c7   :  { %3661 = vmatmul.mubr.bf16.gmra.mrb[160].mxu1 %v2285_v41 }
 0x2cc   :  { %v3618_v14 = vpop.f32.mrb[132].mxu0 }
 0x2cd   :  { %v2206_v2 = vadd.f32 %v3618_v14, %v4806_v6  ;;  %v2197_v46 = vpop.f32.mrb[133].mxu0 }
 0x2ce   :  { %v2198_v22 = vadd.f32 %v4806_v6, %v2197_v46  ;;  %v3619_v62 = vpop.f32.mrb[134].mxu0 }
 0x2cf   :  { %v2209_v37 = vadd.f32 %v3619_v62, %v4806_v6  ;;  %v2200_v19 = vpop.f32.mrb[135].mxu0  ;;  %v2266_v59 = vmax.f32 %v2206_v2, 0.0 }
 0x2d0   :  { %v2201_v0 = vadd.f32 %v4806_v6, %v2200_v19  ;;  %v2264_v3 = vmax.f32 %v2198_v22, 0.0 }
 0x2d1   :  { %v2267_v9 = vmax.f32 %v2209_v37, 0.0 }
 0x2d2   :  { %v2265_v16 = vmax.f32 %v2201_v0, 0.0 }
 0x2d3   :  { %v2287_v1 = vpack.c.bf16 %v2267_v9, %v2266_v59 }
 0x2d4   :  { %v2286_v33 = vpack.c.bf16 %v2265_v16, %v2264_v3 }
 0x2d6   :  { %3664 = vmatprep.mubr.bf16.mxu1 %v2286_v33 }
 0x2d7   :  { %3665 = vmatmul.mubr.bf16.gmra.mrb[164].mxu1 %v2287_v1 }
 0x2dc   :  { %v3622_v45 = vpop.f32.mrb[136].mxu0 }
 0x2dd   :  { %v2222_v4 = vadd.f32 %v3622_v45, %v4806_v6  ;;  %v2213_v28 = vpop.f32.mrb[137].mxu0 }
 0x2de   :  { %v2214_v42 = vadd.f32 %v4806_v6, %v2213_v28  ;;  %v3623_v7 = vpop.f32.mrb[138].mxu0 }
 0x2df   :  { %v2225_v23 = vadd.f32 %v3623_v7, %v4806_v6  ;;  %v2216_v60 = vpop.f32.mrb[139].mxu0  ;;  %v2270_v40 = vmax.f32 %v2222_v4, 0.0 }
 0x2e0   :  { %v2217_v58 = vadd.f32 %v4806_v6, %v2216_v60  ;;  %v2268_v8 = vmax.f32 %v2214_v42, 0.0 }
 0x2e1   :  { %v2271_v21 = vmax.f32 %v2225_v23, 0.0 }
 0x2e2   :  { %v2269_v24 = vmax.f32 %v2217_v58, 0.0 }
 0x2e3   :  { %v2289_v51 = vpack.c.bf16 %v2271_v21, %v2270_v40 }
 0x2e4   :  { %v2288_v11 = vpack.c.bf16 %v2269_v24, %v2268_v8 }
 0x2e6   :  { %3668 = vmatprep.mubr.bf16.mxu1 %v2288_v11 }
 0x2e7   :  { %3669 = vmatmul.mubr.bf16.gmra.mrb[168].mxu1 %v2289_v51 }
 0x2ec   :  { %v3626_v34 = vpop.f32.mrb[140].mxu0 }
 0x2ed   :  { %v2238_v25 = vadd.f32 %v3626_v34, %v4806_v6  ;;  %v2229_v49 = vpop.f32.mrb[141].mxu0 }
 0x2ee   :  { %v2230_v27 = vadd.f32 %v4806_v6, %v2229_v49  ;;  %v3627_v57 = vpop.f32.mrb[142].mxu0 }
 0x2ef   :  { %v2241_v5 = vadd.f32 %v3627_v57, %v4806_v6  ;;  %v2232_v12 = vpop.f32.mrb[143].mxu0  ;;  %v2274_v50 = vmax.f32 %v2238_v25, 0.0 }
 0x2f0   :  { %v2233_v63 = vadd.f32 %v4806_v6, %v2232_v12  ;;  %v2272_v44 = vmax.f32 %v2230_v27, 0.0 }
 0x2f1   :  { %v2275_v15 = vmax.f32 %v2241_v5, 0.0 }
 0x2f2   :  { %v2273_v38 = vmax.f32 %v2233_v63, 0.0 }
 0x2f3   :  { %v2291_v32 = vpack.c.bf16 %v2275_v15, %v2274_v50 }
 0x2f4   :  { %v2290_v52 = vpack.c.bf16 %v2273_v38, %v2272_v44 }
 0x2f6   :  { %3672 = vmatprep.mubr.bf16.mxu1 %v2290_v52 }
 0x2f7   :  { %3673 = vmatmul.mubr.bf16.gmra.mrb[172].mxu1 %v2291_v32 }
 0x35a   :  { %v3646_v35 = vpop.f32.mrb[144].mxu1 }
 0x35b   :  { %v2406_v48 = vadd.f32 %v3646_v35, %v4861_v10  ;;  %v2397_v53 = vpop.f32.mrb[145].mxu1 }
 0x35c   :  { %v2398_v39 = vadd.f32 %v4861_v10, %v2397_v53  ;;  %v3647_v6 = vpop.f32.mrb[146].mxu1 }
 0x35d   :  { %v2409_v56 = vadd.f32 %v3647_v6, %v4861_v10  ;;  %v2400_v30 = vpop.f32.mrb[147].mxu1  ;;  %v2526_v18 = vmax.f32 %v2406_v48, 0.0 }
 0x35e   :  { %v2401_v43 = vadd.f32 %v4861_v10, %v2400_v30  ;;  %v2524_v26 = vmax.f32 %v2398_v39, 0.0 }
 0x35f   :  { %v2527_v54 = vmax.f32 %v2409_v56, 0.0 }
 0x360   :  { %v2525_v31 = vmax.f32 %v2401_v43, 0.0 }
 0x361   :  { %v2557_v13 = vpack.c.bf16 %v2527_v54, %v2526_v18 }
 0x362   :  { %v2556_v17 = vpack.c.bf16 %v2525_v31, %v2524_v26 }
 0x364   :  { %3692 = vmatprep.mubr.bf16.mxu0 %v2556_v17 }
 0x365   :  { %3693 = vmatmul.mubr.bf16.vlgmr.msra.gmra.mrb[144].mxu0 %v2557_v13 }
 0x36a   :  { %v3650_v61 = vpop.f32.mrb[148].mxu1 }
 0x36b   :  { %v2422_v36 = vadd.f32 %v3650_v61, %v4861_v10  ;;  %v2413_v55 = vpop.f32.mrb[149].mxu1 }
 0x36c   :  { %v2414_v41 = vadd.f32 %v4861_v10, %v2413_v55  ;;  %v3651_v20 = vpop.f32.mrb[150].mxu1 }
 0x36d   :  { %v2425_v14 = vadd.f32 %v3651_v20, %v4861_v10  ;;  %v2416_v2 = vpop.f32.mrb[151].mxu1  ;;  %v2530_v22 = vmax.f32 %v2422_v36, 0.0 }
 0x36e   :  { %v2417_v46 = vadd.f32 %v4861_v10, %v2416_v2  ;;  %v2528_v37 = vmax.f32 %v2414_v41, 0.0 }
 0x36f   :  { %v2531_v62 = vmax.f32 %v2425_v14, 0.0 }
 0x370   :  { %v2529_v19 = vmax.f32 %v2417_v46, 0.0 }
 0x371   :  { %v2559_v0 = vpack.c.bf16 %v2531_v62, %v2530_v22 }
 0x372   :  { %v2558_v59 = vpack.c.bf16 %v2529_v19, %v2528_v37 }
 0x374   :  { %3696 = vmatprep.mubr.bf16.mxu0 %v2558_v59 }
 0x375   :  { %3697 = vmatmul.mubr.bf16.gmra.mrb[148].mxu0 %v2559_v0 }
 0x37a   :  { %v3654_v9 = vpop.f32.mrb[152].mxu1 }
 0x37b   :  { %v2438_v3 = vadd.f32 %v3654_v9, %v4861_v10  ;;  %v2429_v16 = vpop.f32.mrb[153].mxu1 }
 0x37c   :  { %v2430_v1 = vadd.f32 %v4861_v10, %v2429_v16  ;;  %v3655_v33 = vpop.f32.mrb[154].mxu1 }
 0x37d   :  { %v2441_v47 = vadd.f32 %v3655_v33, %v4861_v10  ;;  %v2432_v45 = vpop.f32.mrb[155].mxu1  ;;  %v2534_v28 = vmax.f32 %v2438_v3, 0.0 }
 0x37e   :  { %v2433_v4 = vadd.f32 %v4861_v10, %v2432_v45  ;;  %v2532_v7 = vmax.f32 %v2430_v1, 0.0 }
 0x37f   :  { %v2535_v42 = vmax.f32 %v2441_v47, 0.0 }
 0x380   :  { %v2533_v23 = vmax.f32 %v2433_v4, 0.0 }
 0x381   :  { %v2561_v60 = vpack.c.bf16 %v2535_v42, %v2534_v28 }
 0x382   :  { %v2560_v29 = vpack.c.bf16 %v2533_v23, %v2532_v7 }
 0x384   :  { %3700 = vmatprep.mubr.bf16.mxu0 %v2560_v29 }
 0x385   :  { %3701 = vmatmul.mubr.bf16.gmra.mrb[152].mxu0 %v2561_v60 }
 0x38a   :  { %v3658_v58 = vpop.f32.mrb[156].mxu1 }
 0x38b   :  { %v2454_v40 = vadd.f32 %v3658_v58, %v4861_v10  ;;  %v2445_v21 = vpop.f32.mrb[157].mxu1 }
 0x38c   :  { %v2446_v8 = vadd.f32 %v4861_v10, %v2445_v21  ;;  %v3659_v24 = vpop.f32.mrb[158].mxu1 }
 0x38d   :  { %v2457_v51 = vadd.f32 %v3659_v24, %v4861_v10  ;;  %v2448_v11 = vpop.f32.mrb[159].mxu1  ;;  %v2538_v25 = vmax.f32 %v2454_v40, 0.0 }
 0x38e   :  { %v2449_v34 = vadd.f32 %v4861_v10, %v2448_v11  ;;  %v2536_v27 = vmax.f32 %v2446_v8, 0.0 }
 0x38f   :  { %v2539_v49 = vmax.f32 %v2457_v51, 0.0 }
 0x390   :  { %v2537_v57 = vmax.f32 %v2449_v34, 0.0  ;;  %v4898_v34 = vld [vmem:[%s5036_s8] ss:$0 sm:$0xff] }
 0x391   :  { %v2563_v5 = vpack.c.bf16 %v2539_v49, %v2538_v25 }
 0x392   :  { %v2562_v12 = vpack.c.bf16 %v2537_v57, %v2536_v27 }
 0x394   :  { %3704 = vmatprep.mubr.bf16.mxu0 %v2562_v12 }
 0x395   :  { %3705 = vmatmul.mubr.bf16.gmra.mrb[156].mxu0 %v2563_v5 }
 0x39a   :  { %v3662_v63 = vpop.f32.mrb[160].mxu1 }
 0x39b   :  { %v2470_v50 = vadd.f32 %v3662_v63, %v4861_v10  ;;  %v2461_v15 = vpop.f32.mrb[161].mxu1 }
 0x39c   :  { %v2462_v44 = vadd.f32 %v4861_v10, %v2461_v15  ;;  %v3663_v38 = vpop.f32.mrb[162].mxu1 }
 0x39d   :  { %v2473_v32 = vadd.f32 %v3663_v38, %v4861_v10  ;;  %v2464_v52 = vpop.f32.mrb[163].mxu1  ;;  %v2542_v48 = vmax.f32 %v2470_v50, 0.0 }
 0x39e   :  { %v2465_v35 = vadd.f32 %v4861_v10, %v2464_v52  ;;  %v2540_v39 = vmax.f32 %v2462_v44, 0.0 }
 0x39f   :  { %v2543_v53 = vmax.f32 %v2473_v32, 0.0 }
 0x3a0   :  { %v2541_v6 = vmax.f32 %v2465_v35, 0.0 }
 0x3a1   :  { %v2565_v56 = vpack.c.bf16 %v2543_v53, %v2542_v48 }
 0x3a2   :  { %v2564_v30 = vpack.c.bf16 %v2541_v6, %v2540_v39 }
 0x3a4   :  { %3708 = vmatprep.mubr.bf16.mxu0 %v2564_v30 }
 0x3a5   :  { %3709 = vmatmul.mubr.bf16.gmra.mrb[160].mxu0 %v2565_v56 }
 0x3aa   :  { %v3666_v43 = vpop.f32.mrb[164].mxu1 }
 0x3ab   :  { %v2486_v18 = vadd.f32 %v3666_v43, %v4861_v10  ;;  %v2477_v54 = vpop.f32.mrb[165].mxu1 }
 0x3ac   :  { %v2478_v26 = vadd.f32 %v4861_v10, %v2477_v54  ;;  %v3667_v31 = vpop.f32.mrb[166].mxu1 }
 0x3ad   :  { %v2489_v13 = vadd.f32 %v3667_v31, %v4861_v10  ;;  %v2480_v17 = vpop.f32.mrb[167].mxu1  ;;  %v2546_v36 = vmax.f32 %v2486_v18, 0.0 }
 0x3ae   :  { %v2481_v61 = vadd.f32 %v4861_v10, %v2480_v17  ;;  %v2544_v41 = vmax.f32 %v2478_v26, 0.0 }
 0x3af   :  { %v2547_v55 = vmax.f32 %v2489_v13, 0.0 }
 0x3b0   :  { %v2545_v20 = vmax.f32 %v2481_v61, 0.0 }
 0x3b1   :  { %v2567_v14 = vpack.c.bf16 %v2547_v55, %v2546_v36 }
 0x3b2   :  { %v2566_v2 = vpack.c.bf16 %v2545_v20, %v2544_v41 }
 0x3b4   :  { %3712 = vmatprep.mubr.bf16.mxu0 %v2566_v2 }
 0x3b5   :  { %3713 = vmatmul.mubr.bf16.gmra.mrb[164].mxu0 %v2567_v14 }
 0x3ba   :  { %v3670_v46 = vpop.f32.mrb[168].mxu1 }
 0x3bb   :  { %v2502_v22 = vadd.f32 %v3670_v46, %v4861_v10  ;;  %v2493_v62 = vpop.f32.mrb[169].mxu1 }
 0x3bc   :  { %v2494_v37 = vadd.f32 %v4861_v10, %v2493_v62  ;;  %v3671_v19 = vpop.f32.mrb[170].mxu1 }
 0x3bd   :  { %v2505_v0 = vadd.f32 %v3671_v19, %v4861_v10  ;;  %v2496_v59 = vpop.f32.mrb[171].mxu1  ;;  %v2550_v3 = vmax.f32 %v2502_v22, 0.0 }
 0x3be   :  { %v2497_v9 = vadd.f32 %v4861_v10, %v2496_v59  ;;  %v2548_v1 = vmax.f32 %v2494_v37, 0.0 }
 0x3bf   :  { %v2551_v16 = vmax.f32 %v2505_v0, 0.0 }
 0x3c0   :  { %v2549_v33 = vmax.f32 %v2497_v9, 0.0 }
 0x3c1   :  { %v2569_v47 = vpack.c.bf16 %v2551_v16, %v2550_v3 }
 0x3c2   :  { %v2568_v45 = vpack.c.bf16 %v2549_v33, %v2548_v1 }
 0x3c4   :  { %3716 = vmatprep.mubr.bf16.mxu0 %v2568_v45 }
 0x3c5   :  { %3717 = vmatmul.mubr.bf16.gmra.mrb[168].mxu0 %v2569_v47 }
 0x3ca   :  { %v3674_v4 = vpop.f32.mrb[172].mxu1 }
 0x3cb   :  { %v2518_v28 = vadd.f32 %v3674_v4, %v4861_v10  ;;  %v2509_v42 = vpop.f32.mrb[173].mxu1 }
 0x3cc   :  { %v2510_v7 = vadd.f32 %v4861_v10, %v2509_v42  ;;  %v3675_v23 = vpop.f32.mrb[174].mxu1 }
 0x3cd   :  { %v2521_v60 = vadd.f32 %v3675_v23, %v4861_v10  ;;  %v2512_v29 = vpop.f32.mrb[175].mxu1  ;;  %v2554_v40 = vmax.f32 %v2518_v28, 0.0 }
 0x3ce   :  { %v2513_v58 = vadd.f32 %v4861_v10, %v2512_v29  ;;  %v2552_v8 = vmax.f32 %v2510_v7, 0.0 }
 0x3cf   :  { %v2555_v21 = vmax.f32 %v2521_v60, 0.0 }
 0x3d0   :  { %v2553_v24 = vmax.f32 %v2513_v58, 0.0 }
 0x3d1   :  { %v2571_v51 = vpack.c.bf16 %v2555_v21, %v2554_v40 }
 0x3d2   :  { %v2570_v11 = vpack.c.bf16 %v2553_v24, %v2552_v8 }
 0x3d4   :  { %3720 = vmatprep.mubr.bf16.mxu0 %v2570_v11 }
 0x3d5   :  { %3721 = vmatmul.mubr.bf16.gmra.mrb[172].mxu0 %v2571_v51 }
 0x438   :  { %v3694_v25 = vpop.f32.mrb[144].mxu0 }
 0x439   :  { %v2686_v49 = vadd.f32 %v3694_v25, %v4898_v34  ;;  %v2677_v27 = vpop.f32.mrb[145].mxu0 }
 0x43a   :  { %v2678_v57 = vadd.f32 %v4898_v34, %v2677_v27  ;;  %v3695_v10 = vpop.f32.mrb[146].mxu0 }
 0x43b   :  { %2806 = vst [vmem:[%s5037_s9 + $0x10] sm:$0xff] %v2686_v49  ;;  %v2689_v5 = vadd.f32 %v3695_v10, %v4898_v34  ;;  %v2680_v12 = vpop.f32.mrb[147].mxu0 }
 0x43c   :  { %2804 = vst [vmem:[%s5037_s9] sm:$0xff] %v2678_v57  ;;  %v2681_v63 = vadd.f32 %v4898_v34, %v2680_v12 }
 0x43d   :  { %2807 = vst [vmem:[%s5037_s9 + $0x18] sm:$0xff] %v2689_v5 }
 0x43e   :  { %2805 = vst [vmem:[%s5037_s9 + $0x8] sm:$0xff] %v2681_v63 }
 0x448   :  { %v3698_v50 = vpop.f32.mrb[148].mxu0 }
 0x449   :  { %v2702_v15 = vadd.f32 %v3698_v50, %v4898_v34  ;;  %v2693_v44 = vpop.f32.mrb[149].mxu0 }
 0x44a   :  { %v2694_v38 = vadd.f32 %v4898_v34, %v2693_v44  ;;  %v3699_v32 = vpop.f32.mrb[150].mxu0 }
 0x44b   :  { %2810 = vst [vmem:[%s5037_s9 + $0x30] sm:$0xff] %v2702_v15  ;;  %v2705_v52 = vadd.f32 %v3699_v32, %v4898_v34  ;;  %v2696_v35 = vpop.f32.mrb[151].mxu0 }
 0x44c   :  { %2808 = vst [vmem:[%s5037_s9 + $0x20] sm:$0xff] %v2694_v38  ;;  %v2697_v48 = vadd.f32 %v4898_v34, %v2696_v35 }
 0x44d   :  { %2811 = vst [vmem:[%s5037_s9 + $0x38] sm:$0xff] %v2705_v52 }
 0x44e   :  { %2809 = vst [vmem:[%s5037_s9 + $0x28] sm:$0xff] %v2697_v48 }
 0x458   :  { %v3702_v53 = vpop.f32.mrb[152].mxu0 }
 0x459   :  { %v2718_v39 = vadd.f32 %v3702_v53, %v4898_v34  ;;  %v2709_v6 = vpop.f32.mrb[153].mxu0 }
 0x45a   :  { %v2710_v56 = vadd.f32 %v4898_v34, %v2709_v6  ;;  %v3703_v30 = vpop.f32.mrb[154].mxu0 }
 0x45b   :  { %2814 = vst [vmem:[%s5037_s9 + $0x50] sm:$0xff] %v2718_v39  ;;  %v2721_v43 = vadd.f32 %v3703_v30, %v4898_v34  ;;  %v2712_v18 = vpop.f32.mrb[155].mxu0 }
 0x45c   :  { %2812 = vst [vmem:[%s5037_s9 + $0x40] sm:$0xff] %v2710_v56  ;;  %v2713_v54 = vadd.f32 %v4898_v34, %v2712_v18 }
 0x45d   :  { %2815 = vst [vmem:[%s5037_s9 + $0x58] sm:$0xff] %v2721_v43 }
 0x45e   :  { %2813 = vst [vmem:[%s5037_s9 + $0x48] sm:$0xff] %v2713_v54 }
 0x468   :  { %v3706_v26 = vpop.f32.mrb[156].mxu0 }
 0x469   :  { %v2734_v31 = vadd.f32 %v3706_v26, %v4898_v34  ;;  %v2725_v13 = vpop.f32.mrb[157].mxu0 }
 0x46a   :  { %v2726_v17 = vadd.f32 %v4898_v34, %v2725_v13  ;;  %v3707_v61 = vpop.f32.mrb[158].mxu0 }
 0x46b   :  { %2818 = vst [vmem:[%s5037_s9 + $0x70] sm:$0xff] %v2734_v31  ;;  %v2737_v36 = vadd.f32 %v3707_v61, %v4898_v34  ;;  %v2728_v55 = vpop.f32.mrb[159].mxu0 }
 0x46c   :  { %2816 = vst [vmem:[%s5037_s9 + $0x60] sm:$0xff] %v2726_v17  ;;  %v2729_v41 = vadd.f32 %v4898_v34, %v2728_v55 }
 0x46d   :  { %2819 = vst [vmem:[%s5037_s9 + $0x78] sm:$0xff] %v2737_v36 }
 0x46e   :  { %2817 = vst [vmem:[%s5037_s9 + $0x68] sm:$0xff] %v2729_v41 }
 0x478   :  { %v3710_v20 = vpop.f32.mrb[160].mxu0 }
 0x479   :  { %v2750_v14 = vadd.f32 %v3710_v20, %v4898_v34  ;;  %v2741_v2 = vpop.f32.mrb[161].mxu0 }
 0x47a   :  { %v2742_v46 = vadd.f32 %v4898_v34, %v2741_v2  ;;  %v3711_v22 = vpop.f32.mrb[162].mxu0 }
 0x47b   :  { %2822 = vst [vmem:[%s5037_s9 + $0x90] sm:$0xff] %v2750_v14  ;;  %v2753_v62 = vadd.f32 %v3711_v22, %v4898_v34  ;;  %v2744_v37 = vpop.f32.mrb[163].mxu0 }
 0x47c   :  { %2820 = vst [vmem:[%s5037_s9 + $0x80] sm:$0xff] %v2742_v46  ;;  %v2745_v19 = vadd.f32 %v4898_v34, %v2744_v37 }
 0x47d   :  { %2823 = vst [vmem:[%s5037_s9 + $0x98] sm:$0xff] %v2753_v62 }
 0x47e   :  { %2821 = vst [vmem:[%s5037_s9 + $0x88] sm:$0xff] %v2745_v19 }
 0x488   :  { %v3714_v0 = vpop.f32.mrb[164].mxu0 }
 0x489   :  { %v2766_v59 = vadd.f32 %v3714_v0, %v4898_v34  ;;  %v2757_v9 = vpop.f32.mrb[165].mxu0 }
 0x48a   :  { %v2758_v3 = vadd.f32 %v4898_v34, %v2757_v9  ;;  %v3715_v16 = vpop.f32.mrb[166].mxu0 }
 0x48b   :  { %2826 = vst [vmem:[%s5037_s9 + $0xb0] sm:$0xff] %v2766_v59  ;;  %v2769_v1 = vadd.f32 %v3715_v16, %v4898_v34  ;;  %v2760_v33 = vpop.f32.mrb[167].mxu0 }
 0x48c   :  { %2824 = vst [vmem:[%s5037_s9 + $0xa0] sm:$0xff] %v2758_v3  ;;  %v2761_v47 = vadd.f32 %v4898_v34, %v2760_v33 }
 0x48d   :  { %2827 = vst [vmem:[%s5037_s9 + $0xb8] sm:$0xff] %v2769_v1 }
 0x48e   :  { %2825 = vst [vmem:[%s5037_s9 + $0xa8] sm:$0xff] %v2761_v47 }
 0x498   :  { %v3718_v45 = vpop.f32.mrb[168].mxu0 }
 0x499   :  { %v2782_v4 = vadd.f32 %v3718_v45, %v4898_v34  ;;  %v2773_v28 = vpop.f32.mrb[169].mxu0 }
 0x49a   :  { %v2774_v42 = vadd.f32 %v4898_v34, %v2773_v28  ;;  %v3719_v7 = vpop.f32.mrb[170].mxu0 }
 0x49b   :  { %2830 = vst [vmem:[%s5037_s9 + $0xd0] sm:$0xff] %v2782_v4  ;;  %v2785_v23 = vadd.f32 %v3719_v7, %v4898_v34  ;;  %v2776_v60 = vpop.f32.mrb[171].mxu0 }
 0x49c   :  { %2828 = vst [vmem:[%s5037_s9 + $0xc0] sm:$0xff] %v2774_v42  ;;  %v2777_v29 = vadd.f32 %v4898_v34, %v2776_v60 }
 0x49d   :  { %2831 = vst [vmem:[%s5037_s9 + $0xd8] sm:$0xff] %v2785_v23 }
 0x49e   :  { %2829 = vst [vmem:[%s5037_s9 + $0xc8] sm:$0xff] %v2777_v29 }
 0x4a8   :  { %v3722_v58 = vpop.f32.mrb[172].mxu0 }
 0x4a9   :  { %v2798_v40 = vadd.f32 %v3722_v58, %v4898_v34  ;;  %v2789_v21 = vpop.f32.mrb[173].mxu0 }
 0x4aa   :  { %v2790_v8 = vadd.f32 %v4898_v34, %v2789_v21  ;;  %v3723_v24 = vpop.f32.mrb[174].mxu0 }
 0x4ab   :  { %2834 = vst [vmem:[%s5037_s9 + $0xf0] sm:$0xff] %v2798_v40  ;;  %v2801_v51 = vadd.f32 %v3723_v24, %v4898_v34  ;;  %v2792_v11 = vpop.f32.mrb[175].mxu0 }
 0x4ac   :  { %2832 = vst [vmem:[%s5037_s9 + $0xe0] sm:$0xff] %v2790_v8  ;;  %v2793_v25 = vadd.f32 %v4898_v34, %v2792_v11 }
 0x4ad   :  { %2835 = vst [vmem:[%s5037_s9 + $0xf8] sm:$0xff] %v2801_v51 }
 0x4ae   :  { %2833 = vst [vmem:[%s5037_s9 + $0xe8] sm:$0xff] %v2793_v25 }

</bundles_post_ra>
